<compile_context>
chip_gen: v5e
topology: v5e:2x2
jax: 0.10.0
libtpu: 0.0.40
codegen_flags: <defaults>
</compile_context>

<pallas_src>
import functools

import jax
import jax.numpy as jnp
from jax.experimental import pallas as pl
from jax.experimental.pallas import tpu as pltpu

BN_EPS = 1e-5
VMEM_LIMIT_BYTES = 48 * 1024 * 1024  # safe on v5e/v6e/v7x (v7x has 64 MiB/TC)


def _round_up(x, m):
    return -(-x // m) * m


# ----------------------- fused GEMM + bias + LeakyReLU ---------------------- #

def _fused_matmul_kernel(a_ref, w_ref, bias_ref, o_ref, *, slope):
    # a_ref: (tm, K) bf16 im2col patches, w_ref: (K, Cp) bf16 (BN scale folded),
    # bias_ref: (1, Cp) f32.  MXU bf16 matmul with f32 accumulate.
    y = jnp.dot(a_ref[...], w_ref[...], preferred_element_type=jnp.float32)
    y = y + bias_ref[...]                       # folded BatchNorm bias
    y = jnp.where(y >= 0.0, y, slope * y)       # LeakyReLU(0.1)
    o_ref[...] = y.astype(o_ref.dtype)


def fused_conv_matmul(a, w, bias, *, slope=0.1, out_dtype=jnp.bfloat16):
    """(M, K) @ (K, Cout) with fused bias + LeakyReLU, tiled over M.

    Cout is padded up to a multiple of 128 (lane-dense output / full MXU N),
    operands are fed to the MXU in bf16, result rows/columns are sliced back.
    """
    M, K = a.shape
    Cout = w.shape[1]
    Cp = _round_up(Cout, 128)
    tm = 512 if M >= 512 else _round_up(M, 8)
    Mp = _round_up(M, tm)

    if Mp != M:
        a = jnp.pad(a, ((0, Mp - M), (0, 0)))
    if Cp != Cout:
        w = jnp.pad(w, ((0, 0), (0, Cp - Cout)))
        bias = jnp.pad(bias, ((0, Cp - Cout),))

    a = a.astype(jnp.bfloat16)
    w = w.astype(jnp.bfloat16)
    bias2 = bias.reshape(1, Cp).astype(jnp.float32)

    kernel = functools.partial(_fused_matmul_kernel, slope=slope)
    out = pl.pallas_call(
        kernel,
        out_shape=jax.ShapeDtypeStruct((Mp, Cp), out_dtype),
        grid_spec=pltpu.PrefetchScalarGridSpec(
            num_scalar_prefetch=0,
            grid=(Mp // tm,),
            in_specs=[
                pl.BlockSpec((tm, K), lambda i: (i, 0)),    # patch-row tile
                pl.BlockSpec((K, Cp), lambda i: (0, 0)),    # resident weight
                pl.BlockSpec((1, Cp), lambda i: (0, 0)),    # folded-BN bias
            ],
            out_specs=pl.BlockSpec((tm, Cp), lambda i: (i, 0)),
        ),
        compiler_params=pltpu.CompilerParams(
            dimension_semantics=("parallel",),
            vmem_limit_bytes=VMEM_LIMIT_BYTES,
        ),
    )(a, w, bias2)
    return out[:M, :Cout]


# ----------------- final conv (Cout=1) as a VPU reduction ------------------- #

def _final_sigmoid_kernel(a_ref, w_ref, o_ref):
    # a_ref: (Mp, K) bf16 patches, w_ref: (1, K) bf16 single filter.
    a = a_ref[...].astype(jnp.float32)
    w = w_ref[...].astype(jnp.float32)
    y = jnp.sum(a * w, axis=-1, keepdims=True)          # (Mp, 1)
    o_ref[...] = 1.0 / (1.0 + jnp.exp(-y))               # sigmoid (EUP exp)


def final_conv_sigmoid(a, w_vec):
    """Final conv with a single output channel: per-row dot + sigmoid."""
    M, K = a.shape
    Mp = _round_up(M, 8)
    if Mp != M:
        a = jnp.pad(a, ((0, Mp - M), (0, 0)))
    a = a.astype(jnp.bfloat16)
    w2 = w_vec.reshape(1, K).astype(jnp.bfloat16)

    out = pl.pallas_call(
        _final_sigmoid_kernel,
        out_shape=jax.ShapeDtypeStruct((Mp, 1), jnp.float32),
        grid_spec=pltpu.PrefetchScalarGridSpec(
            num_scalar_prefetch=0,
            grid=(1,),
            in_specs=[
                pl.BlockSpec((Mp, K), lambda i: (0, 0)),
                pl.BlockSpec((1, K), lambda i: (0, 0)),
            ],
            out_specs=pl.BlockSpec((Mp, 1), lambda i: (0, 0)),
        ),
        compiler_params=pltpu.CompilerParams(
            dimension_semantics=("arbitrary",),
            vmem_limit_bytes=VMEM_LIMIT_BYTES,
        ),
    )(a, w2)
    return out[:M]


# ------------------------------ conv plumbing ------------------------------- #

def _im2col(x, kh, kw, stride, pad):
    # x: (N, H, W, C) NHWC -> (N, Ho, Wo, kh*kw*C)   [(kh,kw) slow, C fast]
    N, H, W, C = x.shape
    xp = jnp.pad(x, ((0, 0), (pad, pad), (pad, pad), (0, 0)))
    Ho = (H + 2 * pad - kh) // stride + 1
    Wo = (W + 2 * pad - kw) // stride + 1
    cols = []
    for i in range(kh):
        for j in range(kw):
            cols.append(xp[:, i:i + stride * Ho:stride, j:j + stride * Wo:stride, :])
    patches = jnp.stack(cols, axis=3)  # (N, Ho, Wo, kh*kw, C)
    return patches.reshape(N, Ho, Wo, kh * kw * C), Ho, Wo


def conv_bn_leaky(x, w_mat, bias, k, stride, pad, slope=0.1):
    # x: (N, H, W, Cin) NHWC bf16; w_mat: (k*k*Cin, Cout) with BN scale folded.
    N = x.shape[0]
    patches, Ho, Wo = _im2col(x, k, k, stride, pad)
    K = patches.shape[-1]
    a = patches.reshape(N * Ho * Wo, K)
    y = fused_conv_matmul(a, w_mat, bias, slope=slope, out_dtype=jnp.bfloat16)
    return y.reshape(N, Ho, Wo, w_mat.shape[1])


# ----------------------------- parameter init ------------------------------- #

def init_discriminator_params(key, image_size, n_channels, ndf):
    keys = iter(jax.random.split(key, 128))

    def conv_layer(cin, cout, k, stride, pad, use_bn):
        # PyTorch weight (Cout, Cin, k, k) <-> here (k, k, Cin, Cout) reshaped
        # to the im2col matrix (k*k*Cin, Cout); same contraction semantics.
        w = 0.02 * jax.random.normal(next(keys), (k, k, cin, cout), jnp.float32)
        w_mat = w.reshape(k * k * cin, cout)
        if use_bn:
            gamma = 1.0 + 0.02 * jax.random.normal(next(keys), (cout,), jnp.float32)
            beta = 0.02 * jax.random.normal(next(keys), (cout,), jnp.float32)
            mean = 0.02 * jax.random.normal(next(keys), (cout,), jnp.float32)
            var = 1.0 + 0.1 * jax.random.uniform(next(keys), (cout,), jnp.float32)
            scale = gamma / jnp.sqrt(var + BN_EPS)
            bias = beta - mean * scale
            w_mat = w_mat * scale[None, :]        # fold BN scale into weights
        else:
            bias = jnp.zeros((cout,), jnp.float32)
        return {"w": w_mat, "bias": bias, "k": k, "stride": stride, "pad": pad}

    # --- mirrors the PyTorch Discriminator.__init__ construction loop ---
    main = []
    currsize = image_size
    main.append(conv_layer(n_channels, ndf, 4, 2, 1, use_bn=False))
    currsize //= 2
    multiplier = 1
    while currsize > 4:
        main.append(conv_layer(ndf * multiplier, ndf * multiplier * 2, 4, 2, 1, use_bn=True))
        main.append(conv_layer(ndf * multiplier * 2, ndf * multiplier * 2, 3, 1, 1, use_bn=True))
        currsize //= 2
        multiplier *= 2
    final = conv_layer(ndf * multiplier, 1, 4, 1, 0, use_bn=False)
    return {"main": main, "final": final}


# --------------------------------- forward ---------------------------------- #

def discriminator_forward(params, x_nchw):
    x = jnp.transpose(x_nchw, (0, 2, 3, 1)).astype(jnp.bfloat16)  # NCHW -> NHWC bf16
    for layer in params["main"]:
        x = conv_bn_leaky(x, layer["w"], layer["bias"],
                          layer["k"], layer["stride"], layer["pad"], slope=0.1)
    features_nhwc = x

    f = params["final"]
    N = features_nhwc.shape[0]
    patches, Ho, Wo = _im2col(features_nhwc, f["k"], f["k"], f["stride"], f["pad"])
    K = patches.shape[-1]
    a = patches.reshape(N * Ho * Wo, K)
    result_flat = final_conv_sigmoid(a, f["w"].reshape(K))        # (N*Ho*Wo, 1)
    result_nhwc = result_flat.reshape(N, Ho, Wo, 1)

    features = jnp.transpose(features_nhwc, (0, 3, 1, 2)).astype(jnp.float32)
    result = jnp.transpose(result_nhwc, (0, 3, 1, 2))
    return features, result


# ----------------------------------- main ------------------------------------ #

if __name__ == "__main__":
    # Scaled-down hyperparameters (construction logic identical to the module,
    # which uses image_size=128, n_channels=3, ndf=64).
    image_size = 32
    n_channels = 3
    ndf = 16
    batch = 2

    key = jax.random.PRNGKey(0)
    kp, kx = jax.random.split(key)
    params = init_discriminator_params(kp, image_size, n_channels, ndf)
    x = jax.random.normal(kx, (batch, n_channels, image_size, image_size), jnp.float32)

    fwd = jax.jit(lambda inp: discriminator_forward(params, inp))
    features, result = fwd(x)
    jax.block_until_ready((features, result))

    # Expected shapes per the PyTorch module: features (N, ndf*mult, 4, 4), result (N, 1, 1, 1)
    cs = image_size // 2
    mult = 1
    while cs > 4:
        cs //= 2
        mult *= 2
    assert features.shape == (batch, ndf * mult, 4, 4), features.shape
    assert result.shape == (batch, 1, 1, 1), result.shape
    assert bool(jnp.all((result >= 0.0) & (result <= 1.0)))

    print("KERNEL_OK")
</pallas_src>

<mosaic_0001>
module attributes {stable_mosaic.version = 11 : i64} {
  func.func @_fused_matmul_kernel(%arg0: i32, %arg1: memref<512x48xbf16, #tpu.memory_space<vmem>>, %arg2: memref<48x128xbf16, #tpu.memory_space<vmem>>, %arg3: memref<1x128xf32, #tpu.memory_space<vmem>>, %arg4: memref<512x128xbf16, #tpu.memory_space<vmem>>) attributes {dimension_semantics = [#tpu.dimension_semantics<parallel>], iteration_bounds = array<i64: 1>, scalar_prefetch = 0 : i64, scratch_operands = 0 : i64, tpu.core_type = #tpu.core_type<tc>, window_params = [{transform_indices = @transform_0, window_bounds = array<i64: 512, 48>}, {pipeline_mode = #tpu.pipeline_mode<synchronous>, transform_indices = @transform_1, window_bounds = array<i64: 48, 128>}, {pipeline_mode = #tpu.pipeline_mode<synchronous>, transform_indices = @transform_2, window_bounds = array<i64: 1, 128>}, {transform_indices = @transform_3, window_bounds = array<i64: 512, 128>}]} {
    %c0 = arith.constant 0 : index
    %c0_0 = arith.constant 0 : index
    %0 = vector.load %arg1[%c0, %c0_0] : memref<512x48xbf16, #tpu.memory_space<vmem>>, vector<512x48xbf16>
    %c0_1 = arith.constant 0 : index
    %c0_2 = arith.constant 0 : index
    %1 = vector.load %arg2[%c0_1, %c0_2] : memref<48x128xbf16, #tpu.memory_space<vmem>>, vector<48x128xbf16>
    %cst = arith.constant dense<0.000000e+00> : vector<512x128xf32>
    %2 = tpu.matmul %0, %1, %cst {dimension_numbers = #tpu.dot_dimension_numbers<[1], [0], [0], [1], [0, 0, 1, 1], [], []>} : vector<512x48xbf16>, vector<48x128xbf16>, vector<512x128xf32> -> vector<512x128xf32>
    %c0_3 = arith.constant 0 : index
    %c0_4 = arith.constant 0 : index
    %3 = vector.load %arg3[%c0_3, %c0_4] : memref<1x128xf32, #tpu.memory_space<vmem>>, vector<1x128xf32>
    %4 = vector.broadcast %3 : vector<1x128xf32> to vector<512x128xf32>
    %5 = arith.addf %2, %4 : vector<512x128xf32>
    %cst_5 = arith.constant 0.000000e+00 : f32
    %6 = vector.broadcast %cst_5 : f32 to vector<512x128xf32>
    %7 = arith.cmpf oge, %5, %6 : vector<512x128xf32>
    %cst_6 = arith.constant 1.000000e-01 : f32
    %8 = vector.broadcast %cst_6 : f32 to vector<512x128xf32>
    %9 = arith.mulf %8, %5 : vector<512x128xf32>
    %10 = arith.select %7, %5, %9 : vector<512x128xi1>, vector<512x128xf32>
    %11 = arith.truncf %10 : vector<512x128xf32> to vector<512x128xbf16>
    %c0_7 = arith.constant 0 : index
    %c0_8 = arith.constant 0 : index
    %12 = vector.load %arg4[%c0_7, %c0_8] : memref<512x128xbf16, #tpu.memory_space<vmem>>, vector<512x128xbf16>
    tpu.vector_store %arg4[%c0_7, %c0_8], %11 {strides = array<i32>} : memref<512x128xbf16, #tpu.memory_space<vmem>>, vector<512x128xbf16>,
    return
  }
  func.func @transform_0(%arg0: i32) -> (i32, i32) {
    %c0_i32 = arith.constant 0 : i32
    %c0_i32_0 = arith.constant 0 : i32
    return %arg0, %c0_i32 : i32, i32
  }
  func.func @transform_1(%arg0: i32) -> (i32, i32) {
    %c0_i32 = arith.constant 0 : i32
    %c0_i32_0 = arith.constant 0 : i32
    %c0_i32_1 = arith.constant 0 : i32
    return %c0_i32, %c0_i32_0 : i32, i32
  }
  func.func @transform_2(%arg0: i32) -> (i32, i32) {
    %c0_i32 = arith.constant 0 : i32
    %c0_i32_0 = arith.constant 0 : i32
    %c0_i32_1 = arith.constant 0 : i32
    return %c0_i32, %c0_i32_0 : i32, i32
  }
  func.func @transform_3(%arg0: i32) -> (i32, i32) {
    %c0_i32 = arith.constant 0 : i32
    %c0_i32_0 = arith.constant 0 : i32
    return %arg0, %c0_i32 : i32, i32
  }
}

module attributes {stable_mosaic.version = 11 : i64} {
  func.func @_fused_matmul_kernel(%arg0: i32, %arg1: memref<128x256xbf16, #tpu.memory_space<vmem>>, %arg2: memref<256x128xbf16, #tpu.memory_space<vmem>>, %arg3: memref<1x128xf32, #tpu.memory_space<vmem>>, %arg4: memref<128x128xbf16, #tpu.memory_space<vmem>>) attributes {dimension_semantics = [#tpu.dimension_semantics<parallel>], iteration_bounds = array<i64: 1>, scalar_prefetch = 0 : i64, scratch_operands = 0 : i64, tpu.core_type = #tpu.core_type<tc>, window_params = [{transform_indices = @transform_0, window_bounds = array<i64: 128, 256>}, {pipeline_mode = #tpu.pipeline_mode<synchronous>, transform_indices = @transform_1, window_bounds = array<i64: 256, 128>}, {pipeline_mode = #tpu.pipeline_mode<synchronous>, transform_indices = @transform_2, window_bounds = array<i64: 1, 128>}, {transform_indices = @transform_3, window_bounds = array<i64: 128, 128>}]} {
    %c0 = arith.constant 0 : index
    %c0_0 = arith.constant 0 : index
    %0 = vector.load %arg1[%c0, %c0_0] : memref<128x256xbf16, #tpu.memory_space<vmem>>, vector<128x256xbf16>
    %c0_1 = arith.constant 0 : index
    %c0_2 = arith.constant 0 : index
    %1 = vector.load %arg2[%c0_1, %c0_2] : memref<256x128xbf16, #tpu.memory_space<vmem>>, vector<256x128xbf16>
    %cst = arith.constant dense<0.000000e+00> : vector<128x128xf32>
    %2 = tpu.matmul %0, %1, %cst {dimension_numbers = #tpu.dot_dimension_numbers<[1], [0], [0], [1], [0, 0, 1, 1], [], []>} : vector<128x256xbf16>, vector<256x128xbf16>, vector<128x128xf32> -> vector<128x128xf32>
    %c0_3 = arith.constant 0 : index
    %c0_4 = arith.constant 0 : index
    %3 = vector.load %arg3[%c0_3, %c0_4] : memref<1x128xf32, #tpu.memory_space<vmem>>, vector<1x128xf32>
    %4 = vector.broadcast %3 : vector<1x128xf32> to vector<128x128xf32>
    %5 = arith.addf %2, %4 : vector<128x128xf32>
    %cst_5 = arith.constant 0.000000e+00 : f32
    %6 = vector.broadcast %cst_5 : f32 to vector<128x128xf32>
    %7 = arith.cmpf oge, %5, %6 : vector<128x128xf32>
    %cst_6 = arith.constant 1.000000e-01 : f32
    %8 = vector.broadcast %cst_6 : f32 to vector<128x128xf32>
    %9 = arith.mulf %8, %5 : vector<128x128xf32>
    %10 = arith.select %7, %5, %9 : vector<128x128xi1>, vector<128x128xf32>
    %11 = arith.truncf %10 : vector<128x128xf32> to vector<128x128xbf16>
    %c0_7 = arith.constant 0 : index
    %c0_8 = arith.constant 0 : index
    %12 = vector.load %arg4[%c0_7, %c0_8] : memref<128x128xbf16, #tpu.memory_space<vmem>>, vector<128x128xbf16>
    tpu.vector_store %arg4[%c0_7, %c0_8], %11 {strides = array<i32>} : memref<128x128xbf16, #tpu.memory_space<vmem>>, vector<128x128xbf16>,
    return
  }
  func.func @transform_0(%arg0: i32) -> (i32, i32) {
    %c0_i32 = arith.constant 0 : i32
    %c0_i32_0 = arith.constant 0 : i32
    return %arg0, %c0_i32 : i32, i32
  }
  func.func @transform_1(%arg0: i32) -> (i32, i32) {
    %c0_i32 = arith.constant 0 : i32
    %c0_i32_0 = arith.constant 0 : i32
    %c0_i32_1 = arith.constant 0 : i32
    return %c0_i32, %c0_i32_0 : i32, i32
  }
  func.func @transform_2(%arg0: i32) -> (i32, i32) {
    %c0_i32 = arith.constant 0 : i32
    %c0_i32_0 = arith.constant 0 : i32
    %c0_i32_1 = arith.constant 0 : i32
    return %c0_i32, %c0_i32_0 : i32, i32
  }
  func.func @transform_3(%arg0: i32) -> (i32, i32) {
    %c0_i32 = arith.constant 0 : i32
    %c0_i32_0 = arith.constant 0 : i32
    return %arg0, %c0_i32 : i32, i32
  }
}

module attributes {stable_mosaic.version = 11 : i64} {
  func.func @_fused_matmul_kernel(%arg0: i32, %arg1: memref<128x288xbf16, #tpu.memory_space<vmem>>, %arg2: memref<288x128xbf16, #tpu.memory_space<vmem>>, %arg3: memref<1x128xf32, #tpu.memory_space<vmem>>, %arg4: memref<128x128xbf16, #tpu.memory_space<vmem>>) attributes {dimension_semantics = [#tpu.dimension_semantics<parallel>], iteration_bounds = array<i64: 1>, scalar_prefetch = 0 : i64, scratch_operands = 0 : i64, tpu.core_type = #tpu.core_type<tc>, window_params = [{transform_indices = @transform_0, window_bounds = array<i64: 128, 288>}, {pipeline_mode = #tpu.pipeline_mode<synchronous>, transform_indices = @transform_1, window_bounds = array<i64: 288, 128>}, {pipeline_mode = #tpu.pipeline_mode<synchronous>, transform_indices = @transform_2, window_bounds = array<i64: 1, 128>}, {transform_indices = @transform_3, window_bounds = array<i64: 128, 128>}]} {
    %c0 = arith.constant 0 : index
    %c0_0 = arith.constant 0 : index
    %0 = vector.load %arg1[%c0, %c0_0] : memref<128x288xbf16, #tpu.memory_space<vmem>>, vector<128x288xbf16>
    %c0_1 = arith.constant 0 : index
    %c0_2 = arith.constant 0 : index
    %1 = vector.load %arg2[%c0_1, %c0_2] : memref<288x128xbf16, #tpu.memory_space<vmem>>, vector<288x128xbf16>
    %cst = arith.constant dense<0.000000e+00> : vector<128x128xf32>
    %2 = tpu.matmul %0, %1, %cst {dimension_numbers = #tpu.dot_dimension_numbers<[1], [0], [0], [1], [0, 0, 1, 1], [], []>} : vector<128x288xbf16>, vector<288x128xbf16>, vector<128x128xf32> -> vector<128x128xf32>
    %c0_3 = arith.constant 0 : index
    %c0_4 = arith.constant 0 : index
    %3 = vector.load %arg3[%c0_3, %c0_4] : memref<1x128xf32, #tpu.memory_space<vmem>>, vector<1x128xf32>
    %4 = vector.broadcast %3 : vector<1x128xf32> to vector<128x128xf32>
    %5 = arith.addf %2, %4 : vector<128x128xf32>
    %cst_5 = arith.constant 0.000000e+00 : f32
    %6 = vector.broadcast %cst_5 : f32 to vector<128x128xf32>
    %7 = arith.cmpf oge, %5, %6 : vector<128x128xf32>
    %cst_6 = arith.constant 1.000000e-01 : f32
    %8 = vector.broadcast %cst_6 : f32 to vector<128x128xf32>
    %9 = arith.mulf %8, %5 : vector<128x128xf32>
    %10 = arith.select %7, %5, %9 : vector<128x128xi1>, vector<128x128xf32>
    %11 = arith.truncf %10 : vector<128x128xf32> to vector<128x128xbf16>
    %c0_7 = arith.constant 0 : index
    %c0_8 = arith.constant 0 : index
    %12 = vector.load %arg4[%c0_7, %c0_8] : memref<128x128xbf16, #tpu.memory_space<vmem>>, vector<128x128xbf16>
    tpu.vector_store %arg4[%c0_7, %c0_8], %11 {strides = array<i32>} : memref<128x128xbf16, #tpu.memory_space<vmem>>, vector<128x128xbf16>,
    return
  }
  func.func @transform_0(%arg0: i32) -> (i32, i32) {
    %c0_i32 = arith.constant 0 : i32
    %c0_i32_0 = arith.constant 0 : i32
    return %arg0, %c0_i32 : i32, i32
  }
  func.func @transform_1(%arg0: i32) -> (i32, i32) {
    %c0_i32 = arith.constant 0 : i32
    %c0_i32_0 = arith.constant 0 : i32
    %c0_i32_1 = arith.constant 0 : i32
    return %c0_i32, %c0_i32_0 : i32, i32
  }
  func.func @transform_2(%arg0: i32) -> (i32, i32) {
    %c0_i32 = arith.constant 0 : i32
    %c0_i32_0 = arith.constant 0 : i32
    %c0_i32_1 = arith.constant 0 : i32
    return %c0_i32, %c0_i32_0 : i32, i32
  }
  func.func @transform_3(%arg0: i32) -> (i32, i32) {
    %c0_i32 = arith.constant 0 : i32
    %c0_i32_0 = arith.constant 0 : i32
    return %arg0, %c0_i32 : i32, i32
  }
}

module attributes {stable_mosaic.version = 11 : i64} {
  func.func @_fused_matmul_kernel(%arg0: i32, %arg1: memref<32x512xbf16, #tpu.memory_space<vmem>>, %arg2: memref<512x128xbf16, #tpu.memory_space<vmem>>, %arg3: memref<1x128xf32, #tpu.memory_space<vmem>>, %arg4: memref<32x128xbf16, #tpu.memory_space<vmem>>) attributes {dimension_semantics = [#tpu.dimension_semantics<parallel>], iteration_bounds = array<i64: 1>, scalar_prefetch = 0 : i64, scratch_operands = 0 : i64, tpu.core_type = #tpu.core_type<tc>, window_params = [{transform_indices = @transform_0, window_bounds = array<i64: 32, 512>}, {pipeline_mode = #tpu.pipeline_mode<synchronous>, transform_indices = @transform_1, window_bounds = array<i64: 512, 128>}, {pipeline_mode = #tpu.pipeline_mode<synchronous>, transform_indices = @transform_2, window_bounds = array<i64: 1, 128>}, {transform_indices = @transform_3, window_bounds = array<i64: 32, 128>}]} {
    %c0 = arith.constant 0 : index
    %c0_0 = arith.constant 0 : index
    %0 = vector.load %arg1[%c0, %c0_0] : memref<32x512xbf16, #tpu.memory_space<vmem>>, vector<32x512xbf16>
    %c0_1 = arith.constant 0 : index
    %c0_2 = arith.constant 0 : index
    %1 = vector.load %arg2[%c0_1, %c0_2] : memref<512x128xbf16, #tpu.memory_space<vmem>>, vector<512x128xbf16>
    %cst = arith.constant dense<0.000000e+00> : vector<32x128xf32>
    %2 = tpu.matmul %0, %1, %cst {dimension_numbers = #tpu.dot_dimension_numbers<[1], [0], [0], [1], [0, 0, 1, 1], [], []>} : vector<32x512xbf16>, vector<512x128xbf16>, vector<32x128xf32> -> vector<32x128xf32>
    %c0_3 = arith.constant 0 : index
    %c0_4 = arith.constant 0 : index
    %3 = vector.load %arg3[%c0_3, %c0_4] : memref<1x128xf32, #tpu.memory_space<vmem>>, vector<1x128xf32>
    %4 = vector.broadcast %3 : vector<1x128xf32> to vector<32x128xf32>
    %5 = arith.addf %2, %4 : vector<32x128xf32>
    %cst_5 = arith.constant 0.000000e+00 : f32
    %6 = vector.broadcast %cst_5 : f32 to vector<32x128xf32>
    %7 = arith.cmpf oge, %5, %6 : vector<32x128xf32>
    %cst_6 = arith.constant 1.000000e-01 : f32
    %8 = vector.broadcast %cst_6 : f32 to vector<32x128xf32>
    %9 = arith.mulf %8, %5 : vector<32x128xf32>
    %10 = arith.select %7, %5, %9 : vector<32x128xi1>, vector<32x128xf32>
    %11 = arith.truncf %10 : vector<32x128xf32> to vector<32x128xbf16>
    %c0_7 = arith.constant 0 : index
    %c0_8 = arith.constant 0 : index
    %12 = vector.load %arg4[%c0_7, %c0_8] : memref<32x128xbf16, #tpu.memory_space<vmem>>, vector<32x128xbf16>
    tpu.vector_store %arg4[%c0_7, %c0_8], %11 {strides = array<i32>} : memref<32x128xbf16, #tpu.memory_space<vmem>>, vector<32x128xbf16>,
    return
  }
  func.func @transform_0(%arg0: i32) -> (i32, i32) {
    %c0_i32 = arith.constant 0 : i32
    %c0_i32_0 = arith.constant 0 : i32
    return %arg0, %c0_i32 : i32, i32
  }
  func.func @transform_1(%arg0: i32) -> (i32, i32) {
    %c0_i32 = arith.constant 0 : i32
    %c0_i32_0 = arith.constant 0 : i32
    %c0_i32_1 = arith.constant 0 : i32
    return %c0_i32, %c0_i32_0 : i32, i32
  }
  func.func @transform_2(%arg0: i32) -> (i32, i32) {
    %c0_i32 = arith.constant 0 : i32
    %c0_i32_0 = arith.constant 0 : i32
    %c0_i32_1 = arith.constant 0 : i32
    return %c0_i32, %c0_i32_0 : i32, i32
  }
  func.func @transform_3(%arg0: i32) -> (i32, i32) {
    %c0_i32 = arith.constant 0 : i32
    %c0_i32_0 = arith.constant 0 : i32
    return %arg0, %c0_i32 : i32, i32
  }
}

module attributes {stable_mosaic.version = 11 : i64} {
  func.func @_fused_matmul_kernel(%arg0: i32, %arg1: memref<32x576xbf16, #tpu.memory_space<vmem>>, %arg2: memref<576x128xbf16, #tpu.memory_space<vmem>>, %arg3: memref<1x128xf32, #tpu.memory_space<vmem>>, %arg4: memref<32x128xbf16, #tpu.memory_space<vmem>>) attributes {dimension_semantics = [#tpu.dimension_semantics<parallel>], iteration_bounds = array<i64: 1>, scalar_prefetch = 0 : i64, scratch_operands = 0 : i64, tpu.core_type = #tpu.core_type<tc>, window_params = [{transform_indices = @transform_0, window_bounds = array<i64: 32, 576>}, {pipeline_mode = #tpu.pipeline_mode<synchronous>, transform_indices = @transform_1, window_bounds = array<i64: 576, 128>}, {pipeline_mode = #tpu.pipeline_mode<synchronous>, transform_indices = @transform_2, window_bounds = array<i64: 1, 128>}, {transform_indices = @transform_3, window_bounds = array<i64: 32, 128>}]} {
    %c0 = arith.constant 0 : index
    %c0_0 = arith.constant 0 : index
    %0 = vector.load %arg1[%c0, %c0_0] : memref<32x576xbf16, #tpu.memory_space<vmem>>, vector<32x576xbf16>
    %c0_1 = arith.constant 0 : index
    %c0_2 = arith.constant 0 : index
    %1 = vector.load %arg2[%c0_1, %c0_2] : memref<576x128xbf16, #tpu.memory_space<vmem>>, vector<576x128xbf16>
    %cst = arith.constant dense<0.000000e+00> : vector<32x128xf32>
    %2 = tpu.matmul %0, %1, %cst {dimension_numbers = #tpu.dot_dimension_numbers<[1], [0], [0], [1], [0, 0, 1, 1], [], []>} : vector<32x576xbf16>, vector<576x128xbf16>, vector<32x128xf32> -> vector<32x128xf32>
    %c0_3 = arith.constant 0 : index
    %c0_4 = arith.constant 0 : index
    %3 = vector.load %arg3[%c0_3, %c0_4] : memref<1x128xf32, #tpu.memory_space<vmem>>, vector<1x128xf32>
    %4 = vector.broadcast %3 : vector<1x128xf32> to vector<32x128xf32>
    %5 = arith.addf %2, %4 : vector<32x128xf32>
    %cst_5 = arith.constant 0.000000e+00 : f32
    %6 = vector.broadcast %cst_5 : f32 to vector<32x128xf32>
    %7 = arith.cmpf oge, %5, %6 : vector<32x128xf32>
    %cst_6 = arith.constant 1.000000e-01 : f32
    %8 = vector.broadcast %cst_6 : f32 to vector<32x128xf32>
    %9 = arith.mulf %8, %5 : vector<32x128xf32>
    %10 = arith.select %7, %5, %9 : vector<32x128xi1>, vector<32x128xf32>
    %11 = arith.truncf %10 : vector<32x128xf32> to vector<32x128xbf16>
    %c0_7 = arith.constant 0 : index
    %c0_8 = arith.constant 0 : index
    %12 = vector.load %arg4[%c0_7, %c0_8] : memref<32x128xbf16, #tpu.memory_space<vmem>>, vector<32x128xbf16>
    tpu.vector_store %arg4[%c0_7, %c0_8], %11 {strides = array<i32>} : memref<32x128xbf16, #tpu.memory_space<vmem>>, vector<32x128xbf16>,
    return
  }
  func.func @transform_0(%arg0: i32) -> (i32, i32) {
    %c0_i32 = arith.constant 0 : i32
    %c0_i32_0 = arith.constant 0 : i32
    return %arg0, %c0_i32 : i32, i32
  }
  func.func @transform_1(%arg0: i32) -> (i32, i32) {
    %c0_i32 = arith.constant 0 : i32
    %c0_i32_0 = arith.constant 0 : i32
    %c0_i32_1 = arith.constant 0 : i32
    return %c0_i32, %c0_i32_0 : i32, i32
  }
  func.func @transform_2(%arg0: i32) -> (i32, i32) {
    %c0_i32 = arith.constant 0 : i32
    %c0_i32_0 = arith.constant 0 : i32
    %c0_i32_1 = arith.constant 0 : i32
    return %c0_i32, %c0_i32_0 : i32, i32
  }
  func.func @transform_3(%arg0: i32) -> (i32, i32) {
    %c0_i32 = arith.constant 0 : i32
    %c0_i32_0 = arith.constant 0 : i32
    return %arg0, %c0_i32 : i32, i32
  }
}

module attributes {stable_mosaic.version = 11 : i64} {
  func.func @_final_sigmoid_kernel(%arg0: i32, %arg1: memref<8x1024xbf16, #tpu.memory_space<vmem>>, %arg2: memref<1x1024xbf16, #tpu.memory_space<vmem>>, %arg3: memref<8x1xf32, #tpu.memory_space<vmem>>) attributes {dimension_semantics = [#tpu.dimension_semantics<arbitrary>], iteration_bounds = array<i64: 1>, scalar_prefetch = 0 : i64, scratch_operands = 0 : i64, tpu.core_type = #tpu.core_type<tc>, window_params = [{pipeline_mode = #tpu.pipeline_mode<synchronous>, transform_indices = @transform_0, window_bounds = array<i64: 8, 1024>}, {pipeline_mode = #tpu.pipeline_mode<synchronous>, transform_indices = @transform_1, window_bounds = array<i64: 1, 1024>}, {pipeline_mode = #tpu.pipeline_mode<synchronous>, transform_indices = @transform_2, window_bounds = array<i64: 8, 1>}]} {
    %c0 = arith.constant 0 : index
    %c0_0 = arith.constant 0 : index
    %0 = vector.load %arg1[%c0, %c0_0] : memref<8x1024xbf16, #tpu.memory_space<vmem>>, vector<8x1024xbf16>
    %1 = arith.extf %0 : vector<8x1024xbf16> to vector<8x1024xf32>
    %c0_1 = arith.constant 0 : index
    %c0_2 = arith.constant 0 : index
    %2 = vector.load %arg2[%c0_1, %c0_2] : memref<1x1024xbf16, #tpu.memory_space<vmem>>, vector<1x1024xbf16>
    %3 = arith.extf %2 : vector<1x1024xbf16> to vector<1x1024xf32>
    %4 = vector.broadcast %3 : vector<1x1024xf32> to vector<8x1024xf32>
    %5 = arith.mulf %1, %4 : vector<8x1024xf32>
    %cst = arith.constant dense<0.000000e+00> : vector<8xf32>
    %6 = vector.multi_reduction <add>, %5, %cst [1] : vector<8x1024xf32> to vector<8xf32>
    %7 = vector.shape_cast %6 : vector<8xf32> to vector<8x1xf32>
    %cst_3 = arith.constant 0.000000e+00 : f32
    %8 = vector.broadcast %cst_3 : f32 to vector<8x1xf32>
    %9 = arith.subf %8, %7 : vector<8x1xf32>
    %10 = math.exp %9 : vector<8x1xf32>
    %cst_4 = arith.constant 1.000000e+00 : f32
    %11 = vector.broadcast %cst_4 : f32 to vector<8x1xf32>
    %12 = arith.addf %11, %10 : vector<8x1xf32>
    %cst_5 = arith.constant 1.000000e+00 : f32
    %13 = vector.broadcast %cst_5 : f32 to vector<8x1xf32>
    %14 = arith.divf %13, %12 : vector<8x1xf32>
    %c0_6 = arith.constant 0 : index
    %c0_7 = arith.constant 0 : index
    %15 = vector.load %arg3[%c0_6, %c0_7] : memref<8x1xf32, #tpu.memory_space<vmem>>, vector<8x1xf32>
    tpu.vector_store %arg3[%c0_6, %c0_7], %14 {strides = array<i32>} : memref<8x1xf32, #tpu.memory_space<vmem>>, vector<8x1xf32>,
    return
  }
  func.func @transform_0(%arg0: i32) -> (i32, i32) {
    %c0_i32 = arith.constant 0 : i32
    %c0_i32_0 = arith.constant 0 : i32
    %c0_i32_1 = arith.constant 0 : i32
    return %c0_i32, %c0_i32_0 : i32, i32
  }
  func.func @transform_1(%arg0: i32) -> (i32, i32) {
    %c0_i32 = arith.constant 0 : i32
    %c0_i32_0 = arith.constant 0 : i32
    %c0_i32_1 = arith.constant 0 : i32
    return %c0_i32, %c0_i32_0 : i32, i32
  }
  func.func @transform_2(%arg0: i32) -> (i32, i32) {
    %c0_i32 = arith.constant 0 : i32
    %c0_i32_0 = arith.constant 0 : i32
    %c0_i32_1 = arith.constant 0 : i32
    return %c0_i32, %c0_i32_0 : i32, i32
  }
}

</mosaic_0001>

<bundles_post_ra>
// kernel: _lambda_.6
= control target key start
LH: loop header
LB: loop body
LE: loop exit
PB: predicated region body
PF: predicated region fallthrough
CT: control target
= control target key end

     0   :  { %vm267_vm0 = vcmask 392192   ;;  %s1587_s1 = inlined_call_operand.vmem [shape: bf16[48,128], index: 1, kind: input, shape index: {}]   ;;  %s1588_s2 = inlined_call_operand.vmem [shape: f32[1,128], index: 2, kind: input, shape index: {}]   ;;  %s1589_s0 = inlined_call_operand.vmem [shape: bf16[512,48], index: 0, kind: input, shape index: {}]   ;;  %s1590_s3 = inlined_call_operand.vmem [shape: bf16[512,128], index: 3, kind: output, shape index: {}]  }
   0x1   :  { %v1063_v0 = vld [vmem:[%s1587_s1 + $0x10] sm:$0xff]  ;;  %v1062_v1 = vld [vmem:[%s1587_s1 + $0x8] sm:$0xff]  ;;  %v1061_v2 = vld [vmem:[%s1587_s1] sm:$0xff] }
   0x2   :  { %369 = vmatpush.bf16.msra.mxu0 %v1063_v0  ;;  %1255 = vmatpush.bf16.msra.mxu1 %v1063_v0  ;;  %v1029_v3 = vld [vmem:[%s1589_s0] sm:$0xff]  ;;  %v1030_v7 = vld [vmem:[%s1589_s0 + $0x8] sm:$0xff]  ;;  %v1031_v11 = vld [vmem:[%s1589_s0 + $0x10] sm:$0xff] }
   0x3   :  { %1256 = vmatpush.bf16.msra.mxu2 %v1063_v0  ;;  %1257 = vmatpush.bf16.msra.mxu3 %v1063_v0  ;;  %v1037_v4 = vld [vmem:[%s1589_s0 + $0x40] sm:$0xff]  ;;  %v1038_v8 = vld [vmem:[%s1589_s0 + $0x48] sm:$0xff]  ;;  %v1039_v12 = vld [vmem:[%s1589_s0 + $0x50] sm:$0xff] }
   0x4   :  { %v1045_v5 = vld [vmem:[%s1589_s0 + $0x80] sm:$0xff]  ;;  %v1046_v9 = vld [vmem:[%s1589_s0 + $0x88] sm:$0xff]  ;;  %v1047_v13 = vld [vmem:[%s1589_s0 + $0x90] sm:$0xff] }
   0x5   :  { %v1053_v6 = vld [vmem:[%s1589_s0 + $0xc0] sm:$0xff]  ;;  %v1054_v10 = vld [vmem:[%s1589_s0 + $0xc8] sm:$0xff]  ;;  %v1055_v14 = vld [vmem:[%s1589_s0 + $0xd0] sm:$0xff] }
   0x6   :  { %370 = vmatpush.bf16.msra.mxu0 %v1062_v1  ;;  %1258 = vmatpush.bf16.msra.mxu1 %v1062_v1  ;;  %v1032_v15 = vld [vmem:[%s1589_s0 + $0x18] sm:$0xff]  ;;  %v1033_v19 = vld [vmem:[%s1589_s0 + $0x20] sm:$0xff]  ;;  %v1034_v23 = vld [vmem:[%s1589_s0 + $0x28] sm:$0xff] }
   0x7   :  { %1259 = vmatpush.bf16.msra.mxu2 %v1062_v1  ;;  %1260 = vmatpush.bf16.msra.mxu3 %v1062_v1  ;;  %v1040_v16 = vld [vmem:[%s1589_s0 + $0x58] sm:$0xff]  ;;  %v1041_v20 = vld [vmem:[%s1589_s0 + $0x60] sm:$0xff]  ;;  %v1042_v24 = vld [vmem:[%s1589_s0 + $0x68] sm:$0xff] }
   0x8   :  { %v1048_v17 = vld [vmem:[%s1589_s0 + $0x98] sm:$0xff]  ;;  %v1049_v21 = vld [vmem:[%s1589_s0 + $0xa0] sm:$0xff]  ;;  %v1050_v25 = vld [vmem:[%s1589_s0 + $0xa8] sm:$0xff] }
   0x9   :  { %v1056_v18 = vld [vmem:[%s1589_s0 + $0xd8] sm:$0xff]  ;;  %v1057_v22 = vld [vmem:[%s1589_s0 + $0xe0] sm:$0xff]  ;;  %v1058_v26 = vld [vmem:[%s1589_s0 + $0xe8] sm:$0xff] }
   0xa   :  { %371 = vmatpush.bf16.msra.mxu0 %v1061_v2  ;;  %1261 = vmatpush.bf16.msra.mxu1 %v1061_v2  ;;  %v1035_v27 = vld [vmem:[%s1589_s0 + $0x30] sm:$0xff]  ;;  %v1036_v31 = vld [vmem:[%s1589_s0 + $0x38] sm:$0xff]  ;;  %v1425_v37 = vld [vmem:[%s1588_s2] ss:$0 sm:$0xff] }
   0xb   :  { %1262 = vmatpush.bf16.msra.mxu2 %v1061_v2  ;;  %1263 = vmatpush.bf16.msra.mxu3 %v1061_v2  ;;  %v1043_v28 = vld [vmem:[%s1589_s0 + $0x70] sm:$0xff]  ;;  %v1044_v32 = vld [vmem:[%s1589_s0 + $0x78] sm:$0xff] }
   0xc   :  { %v1051_v29 = vld [vmem:[%s1589_s0 + $0xb0] sm:$0xff]  ;;  %v1052_v33 = vld [vmem:[%s1589_s0 + $0xb8] sm:$0xff] }
   0xd   :  { %997 = vmatmul.msk.bf16.vlgmr.msra.gmra.mxu0 %vm267_vm0, %v1029_v3  ;;  %1005 = vmatmul.msk.bf16.vlgmr.msra.gmra.mxu1 %vm267_vm0, %v1037_v4  ;;  %v1059_v30 = vld [vmem:[%s1589_s0 + $0xf0] sm:$0xff]  ;;  %v1060_v34 = vld [vmem:[%s1589_s0 + $0xf8] sm:$0xff] }
   0xe   :  { %1013 = vmatmul.msk.bf16.vlgmr.msra.gmra.mxu2 %vm267_vm0, %v1045_v5  ;;  %1021 = vmatmul.msk.bf16.vlgmr.msra.gmra.mxu3 %vm267_vm0, %v1053_v6 }
  0x1d   :  { %998 = vmatmul.msk.bf16.gmra.mxu0 %vm267_vm0, %v1030_v7  ;;  %1006 = vmatmul.msk.bf16.gmra.mxu1 %vm267_vm0, %v1038_v8 }
  0x1e   :  { %1014 = vmatmul.msk.bf16.gmra.mxu2 %vm267_vm0, %v1046_v9  ;;  %1022 = vmatmul.msk.bf16.gmra.mxu3 %vm267_vm0, %v1054_v10 }
  0x2d   :  { %999 = vmatmul.msk.bf16.gmra.mxu0 %vm267_vm0, %v1031_v11  ;;  %1007 = vmatmul.msk.bf16.gmra.mxu1 %vm267_vm0, %v1039_v12 }
  0x2e   :  { %1015 = vmatmul.msk.bf16.gmra.mxu2 %vm267_vm0, %v1047_v13  ;;  %1023 = vmatmul.msk.bf16.gmra.mxu3 %vm267_vm0, %v1055_v14 }
  0x3d   :  { %1000 = vmatmul.msk.bf16.gmra.mxu0 %vm267_vm0, %v1032_v15  ;;  %1008 = vmatmul.msk.bf16.gmra.mxu1 %vm267_vm0, %v1040_v16 }
  0x3e   :  { %1016 = vmatmul.msk.bf16.gmra.mxu2 %vm267_vm0, %v1048_v17  ;;  %1024 = vmatmul.msk.bf16.gmra.mxu3 %vm267_vm0, %v1056_v18 }
  0x4d   :  { %1001 = vmatmul.msk.bf16.gmra.mxu0 %vm267_vm0, %v1033_v19  ;;  %1009 = vmatmul.msk.bf16.gmra.mxu1 %vm267_vm0, %v1041_v20 }
  0x4e   :  { %1017 = vmatmul.msk.bf16.gmra.mxu2 %vm267_vm0, %v1049_v21  ;;  %1025 = vmatmul.msk.bf16.gmra.mxu3 %vm267_vm0, %v1057_v22 }
  0x5d   :  { %1002 = vmatmul.msk.bf16.gmra.mxu0 %vm267_vm0, %v1034_v23  ;;  %1010 = vmatmul.msk.bf16.gmra.mxu1 %vm267_vm0, %v1042_v24 }
  0x5e   :  { %1018 = vmatmul.msk.bf16.gmra.mxu2 %vm267_vm0, %v1050_v25  ;;  %1026 = vmatmul.msk.bf16.gmra.mxu3 %vm267_vm0, %v1058_v26 }
  0x6d   :  { %1003 = vmatmul.msk.bf16.gmra.mxu0 %vm267_vm0, %v1035_v27  ;;  %1011 = vmatmul.msk.bf16.gmra.mxu1 %vm267_vm0, %v1043_v28 }
  0x6e   :  { %1019 = vmatmul.msk.bf16.gmra.mxu2 %vm267_vm0, %v1051_v29  ;;  %1027 = vmatmul.msk.bf16.gmra.mxu3 %vm267_vm0, %v1059_v30 }
  0x7d   :  { %1004 = vmatmul.msk.bf16.gmra.mxu0 %vm267_vm0, %v1036_v31  ;;  %1012 = vmatmul.msk.bf16.gmra.mxu1 %vm267_vm0, %v1044_v32 }
  0x7e   :  { %1020 = vmatmul.msk.bf16.gmra.mxu2 %vm267_vm0, %v1052_v33  ;;  %1028 = vmatmul.msk.bf16.gmra.mxu3 %vm267_vm0, %v1060_v34 }
  0x8a   :  { %v373_v35 = vpop.f32.mrf.mxu0  ;;  %v413_v36 = vpop.f32.mrf.mxu1 }
  0x8b   :  { %v374_v38 = vadd.f32 %v1425_v37, %v373_v35  ;;  %v414_v39 = vadd.f32 %v1425_v37, %v413_v36 }
  0x8d   :  { %v597_v44 = vmul.f32 0.1, %v374_v38  ;;  %v613_v45 = vmul.f32 0.1, %v414_v39  ;;  %vm533_vm1 = vcmp.ge.f32.partialorder %v374_v38, 0.0  ;;  %vm549_vm2 = vcmp.ge.f32.partialorder %v414_v39, 0.0 }
  0x8f   :  { %v661_v52 = vsel %vm533_vm1, %v374_v38, %v597_v44  ;;  %v677_v53 = vsel %vm549_vm2, %v414_v39, %v613_v45 }
  0x91   :  { %v453_v40 = vpop.f32.mrf.mxu2  ;;  %v493_v41 = vpop.f32.mrf.mxu3 }
  0x92   :  { %v375_v42 = vpop.f32.mrf.mxu0  ;;  %v415_v43 = vpop.f32.mrf.mxu1  ;;  %v454_v50 = vadd.f32 %v1425_v37, %v453_v40  ;;  %v494_v51 = vadd.f32 %v1425_v37, %v493_v41 }
  0x93   :  { %v376_v46 = vadd.f32 %v1425_v37, %v375_v42  ;;  %v416_v47 = vadd.f32 %v1425_v37, %v415_v43 }
  0x94   :  { %v629_v60 = vmul.f32 0.1, %v454_v50  ;;  %v645_v61 = vmul.f32 0.1, %v494_v51  ;;  %vm565_vm5 = vcmp.ge.f32.partialorder %v454_v50, 0.0  ;;  %vm581_vm6 = vcmp.ge.f32.partialorder %v494_v51, 0.0 }
  0x95   :  { %vm534_vm3 = vcmp.ge.f32.partialorder %v376_v46, 0.0  ;;  %v598_v48 = vmul.f32 0.1, %v376_v46  ;;  %vm550_vm4 = vcmp.ge.f32.partialorder %v416_v47, 0.0  ;;  %v614_v49 = vmul.f32 0.1, %v416_v47 }
  0x96   :  { %v693_v4 = vsel %vm565_vm5, %v454_v50, %v629_v60  ;;  %v709_v5 = vsel %vm581_vm6, %v494_v51, %v645_v61 }
  0x97   :  { %v662_v54 = vsel %vm534_vm3, %v376_v46, %v598_v48  ;;  %v678_v55 = vsel %vm550_vm4, %v416_v47, %v614_v49 }
  0x98   :  { %v1067_v56 = vpack.c.bf16 %v662_v54, %v661_v52  ;;  %v1107_v57 = vpack.c.bf16 %v678_v55, %v677_v53 }
  0x99   :  { %v455_v58 = vpop.f32.mrf.mxu2  ;;  %v495_v59 = vpop.f32.mrf.mxu3 }
  0x9a   :  { %1068 = vst [vmem:[%s1590_s3] sm:$0xff] %v1067_v56   ;;  %v456_v62 = vadd.f32 %v1425_v37, %v455_v58  ;;  %v496_v63 = vadd.f32 %v1425_v37, %v495_v59  ;;  %v378_v0 = vpop.f32.mrf.mxu0  ;;  %v418_v1 = vpop.f32.mrf.mxu1 }
  0x9b   :  { %1231 = vst [vmem:[%s1590_s3 + $0x40] sm:$0xff] %v1107_v57   ;;  %v379_v10 = vadd.f32 %v1425_v37, %v378_v0  ;;  %v419_v11 = vadd.f32 %v1425_v37, %v418_v1 }
  0x9c   :  { %vm566_vm7 = vcmp.ge.f32.partialorder %v456_v62, 0.0  ;;  %v630_v2 = vmul.f32 0.1, %v456_v62  ;;  %vm582_vm8 = vcmp.ge.f32.partialorder %v496_v63, 0.0  ;;  %v646_v3 = vmul.f32 0.1, %v496_v63 }
  0x9d   :  { %v599_v16 = vmul.f32 0.1, %v379_v10  ;;  %v615_v17 = vmul.f32 0.1, %v419_v11  ;;  %vm535_vm9 = vcmp.ge.f32.partialorder %v379_v10, 0.0  ;;  %vm551_vm10 = vcmp.ge.f32.partialorder %v419_v11, 0.0 }
  0x9e   :  { %v694_v6 = vsel %vm566_vm7, %v456_v62, %v630_v2  ;;  %v710_v7 = vsel %vm582_vm8, %v496_v63, %v646_v3 }
  0x9f   :  { %v1147_v8 = vpack.c.bf16 %v694_v6, %v693_v4  ;;  %v1187_v9 = vpack.c.bf16 %v710_v7, %v709_v5  ;;  %v663_v24 = vsel %vm535_vm9, %v379_v10, %v599_v16  ;;  %v679_v25 = vsel %vm551_vm10, %v419_v11, %v615_v17 }
  0xa1   :  { %1239 = vst [vmem:[%s1590_s3 + $0x80] sm:$0xff] %v1147_v8   ;;  %v458_v12 = vpop.f32.mrf.mxu2  ;;  %v498_v13 = vpop.f32.mrf.mxu3 }
  0xa2   :  { %1247 = vst [vmem:[%s1590_s3 + $0xc0] sm:$0xff] %v1187_v9   ;;  %v380_v14 = vpop.f32.mrf.mxu0  ;;  %v420_v15 = vpop.f32.mrf.mxu1  ;;  %v459_v22 = vadd.f32 %v1425_v37, %v458_v12  ;;  %v499_v23 = vadd.f32 %v1425_v37, %v498_v13 }
  0xa3   :  { %v381_v18 = vadd.f32 %v1425_v37, %v380_v14  ;;  %v421_v19 = vadd.f32 %v1425_v37, %v420_v15 }
  0xa4   :  { %v631_v32 = vmul.f32 0.1, %v459_v22  ;;  %v647_v33 = vmul.f32 0.1, %v499_v23  ;;  %vm567_vm13 = vcmp.ge.f32.partialorder %v459_v22, 0.0  ;;  %vm583_vm14 = vcmp.ge.f32.partialorder %v499_v23, 0.0 }
  0xa5   :  { %vm536_vm11 = vcmp.ge.f32.partialorder %v381_v18, 0.0  ;;  %v600_v20 = vmul.f32 0.1, %v381_v18  ;;  %vm552_vm12 = vcmp.ge.f32.partialorder %v421_v19, 0.0  ;;  %v616_v21 = vmul.f32 0.1, %v421_v19 }
  0xa6   :  { %v695_v41 = vsel %vm567_vm13, %v459_v22, %v631_v32  ;;  %v711_v42 = vsel %vm583_vm14, %v499_v23, %v647_v33 }
  0xa7   :  { %v664_v26 = vsel %vm536_vm11, %v381_v18, %v600_v20  ;;  %v680_v27 = vsel %vm552_vm12, %v421_v19, %v616_v21 }
  0xa8   :  { %v1072_v28 = vpack.c.bf16 %v664_v26, %v663_v24  ;;  %v1112_v29 = vpack.c.bf16 %v680_v27, %v679_v25 }
  0xa9   :  { %v460_v30 = vpop.f32.mrf.mxu2  ;;  %v500_v31 = vpop.f32.mrf.mxu3 }
  0xaa   :  { %1224 = vst [vmem:[%s1590_s3 + $0x8] sm:$0xff] %v1072_v28   ;;  %v461_v34 = vadd.f32 %v1425_v37, %v460_v30  ;;  %v501_v35 = vadd.f32 %v1425_v37, %v500_v31  ;;  %v383_v36 = vpop.f32.mrf.mxu0  ;;  %v423_v38 = vpop.f32.mrf.mxu1 }
  0xab   :  { %1232 = vst [vmem:[%s1590_s3 + $0x48] sm:$0xff] %v1112_v29   ;;  %v384_v47 = vadd.f32 %v1425_v37, %v383_v36  ;;  %v424_v48 = vadd.f32 %v1425_v37, %v423_v38 }
  0xac   :  { %vm568_vm15 = vcmp.ge.f32.partialorder %v461_v34, 0.0  ;;  %v632_v39 = vmul.f32 0.1, %v461_v34  ;;  %vm584_vm0 = vcmp.ge.f32.partialorder %v501_v35, 0.0  ;;  %v648_v40 = vmul.f32 0.1, %v501_v35 }
  0xad   :  { %v601_v53 = vmul.f32 0.1, %v384_v47  ;;  %v617_v54 = vmul.f32 0.1, %v424_v48  ;;  %vm537_vm1 = vcmp.ge.f32.partialorder %v384_v47, 0.0  ;;  %vm553_vm2 = vcmp.ge.f32.partialorder %v424_v48, 0.0 }
  0xae   :  { %v696_v43 = vsel %vm568_vm15, %v461_v34, %v632_v39  ;;  %v712_v44 = vsel %vm584_vm0, %v501_v35, %v648_v40 }
  0xaf   :  { %v1152_v45 = vpack.c.bf16 %v696_v43, %v695_v41  ;;  %v1192_v46 = vpack.c.bf16 %v712_v44, %v711_v42  ;;  %v665_v61 = vsel %vm537_vm1, %v384_v47, %v601_v53  ;;  %v681_v62 = vsel %vm553_vm2, %v424_v48, %v617_v54 }
  0xb1   :  { %1240 = vst [vmem:[%s1590_s3 + $0x88] sm:$0xff] %v1152_v45   ;;  %v463_v49 = vpop.f32.mrf.mxu2  ;;  %v503_v50 = vpop.f32.mrf.mxu3 }
  0xb2   :  { %1248 = vst [vmem:[%s1590_s3 + $0xc8] sm:$0xff] %v1192_v46   ;;  %v385_v51 = vpop.f32.mrf.mxu0  ;;  %v425_v52 = vpop.f32.mrf.mxu1  ;;  %v464_v59 = vadd.f32 %v1425_v37, %v463_v49  ;;  %v504_v60 = vadd.f32 %v1425_v37, %v503_v50 }
  0xb3   :  { %v386_v55 = vadd.f32 %v1425_v37, %v385_v51  ;;  %v426_v56 = vadd.f32 %v1425_v37, %v425_v52 }
  0xb4   :  { %v633_v5 = vmul.f32 0.1, %v464_v59  ;;  %v649_v6 = vmul.f32 0.1, %v504_v60  ;;  %vm569_vm5 = vcmp.ge.f32.partialorder %v464_v59, 0.0  ;;  %vm585_vm6 = vcmp.ge.f32.partialorder %v504_v60, 0.0 }
  0xb5   :  { %vm538_vm3 = vcmp.ge.f32.partialorder %v386_v55, 0.0  ;;  %v602_v57 = vmul.f32 0.1, %v386_v55  ;;  %vm554_vm4 = vcmp.ge.f32.partialorder %v426_v56, 0.0  ;;  %v618_v58 = vmul.f32 0.1, %v426_v56 }
  0xb6   :  { %v697_v13 = vsel %vm569_vm5, %v464_v59, %v633_v5  ;;  %v713_v14 = vsel %vm585_vm6, %v504_v60, %v649_v6 }
  0xb7   :  { %v666_v63 = vsel %vm538_vm3, %v386_v55, %v602_v57  ;;  %v682_v0 = vsel %vm554_vm4, %v426_v56, %v618_v58 }
  0xb8   :  { %v1077_v1 = vpack.c.bf16 %v666_v63, %v665_v61  ;;  %v1117_v2 = vpack.c.bf16 %v682_v0, %v681_v62 }
  0xb9   :  { %v465_v3 = vpop.f32.mrf.mxu2  ;;  %v505_v4 = vpop.f32.mrf.mxu3 }
  0xba   :  { %1225 = vst [vmem:[%s1590_s3 + $0x10] sm:$0xff] %v1077_v1   ;;  %v466_v7 = vadd.f32 %v1425_v37, %v465_v3  ;;  %v506_v8 = vadd.f32 %v1425_v37, %v505_v4  ;;  %v388_v9 = vpop.f32.mrf.mxu0  ;;  %v428_v10 = vpop.f32.mrf.mxu1 }
  0xbb   :  { %1233 = vst [vmem:[%s1590_s3 + $0x50] sm:$0xff] %v1117_v2   ;;  %v389_v19 = vadd.f32 %v1425_v37, %v388_v9  ;;  %v429_v20 = vadd.f32 %v1425_v37, %v428_v10 }
  0xbc   :  { %vm570_vm7 = vcmp.ge.f32.partialorder %v466_v7, 0.0  ;;  %v634_v11 = vmul.f32 0.1, %v466_v7  ;;  %vm586_vm8 = vcmp.ge.f32.partialorder %v506_v8, 0.0  ;;  %v650_v12 = vmul.f32 0.1, %v506_v8 }
  0xbd   :  { %v603_v25 = vmul.f32 0.1, %v389_v19  ;;  %v619_v26 = vmul.f32 0.1, %v429_v20  ;;  %vm539_vm9 = vcmp.ge.f32.partialorder %v389_v19, 0.0  ;;  %vm555_vm10 = vcmp.ge.f32.partialorder %v429_v20, 0.0 }
  0xbe   :  { %v698_v15 = vsel %vm570_vm7, %v466_v7, %v634_v11  ;;  %v714_v16 = vsel %vm586_vm8, %v506_v8, %v650_v12 }
  0xbf   :  { %v1157_v17 = vpack.c.bf16 %v698_v15, %v697_v13  ;;  %v1197_v18 = vpack.c.bf16 %v714_v16, %v713_v14  ;;  %v667_v33 = vsel %vm539_vm9, %v389_v19, %v603_v25  ;;  %v683_v34 = vsel %vm555_vm10, %v429_v20, %v619_v26 }
  0xc1   :  { %1241 = vst [vmem:[%s1590_s3 + $0x90] sm:$0xff] %v1157_v17   ;;  %v468_v21 = vpop.f32.mrf.mxu2  ;;  %v508_v22 = vpop.f32.mrf.mxu3 }
  0xc2   :  { %1249 = vst [vmem:[%s1590_s3 + $0xd0] sm:$0xff] %v1197_v18   ;;  %v390_v23 = vpop.f32.mrf.mxu0  ;;  %v430_v24 = vpop.f32.mrf.mxu1  ;;  %v469_v31 = vadd.f32 %v1425_v37, %v468_v21  ;;  %v509_v32 = vadd.f32 %v1425_v37, %v508_v22 }
  0xc3   :  { %v391_v27 = vadd.f32 %v1425_v37, %v390_v23  ;;  %v431_v28 = vadd.f32 %v1425_v37, %v430_v24 }
  0xc4   :  { %v635_v42 = vmul.f32 0.1, %v469_v31  ;;  %v651_v43 = vmul.f32 0.1, %v509_v32  ;;  %vm571_vm13 = vcmp.ge.f32.partialorder %v469_v31, 0.0  ;;  %vm587_vm14 = vcmp.ge.f32.partialorder %v509_v32, 0.0 }
  0xc5   :  { %vm540_vm11 = vcmp.ge.f32.partialorder %v391_v27, 0.0  ;;  %v604_v29 = vmul.f32 0.1, %v391_v27  ;;  %vm556_vm12 = vcmp.ge.f32.partialorder %v431_v28, 0.0  ;;  %v620_v30 = vmul.f32 0.1, %v431_v28 }
  0xc6   :  { %v699_v50 = vsel %vm571_vm13, %v469_v31, %v635_v42  ;;  %v715_v51 = vsel %vm587_vm14, %v509_v32, %v651_v43 }
  0xc7   :  { %v668_v35 = vsel %vm540_vm11, %v391_v27, %v604_v29  ;;  %v684_v36 = vsel %vm556_vm12, %v431_v28, %v620_v30 }
  0xc8   :  { %v1082_v38 = vpack.c.bf16 %v668_v35, %v667_v33  ;;  %v1122_v39 = vpack.c.bf16 %v684_v36, %v683_v34 }
  0xc9   :  { %v470_v40 = vpop.f32.mrf.mxu2  ;;  %v510_v41 = vpop.f32.mrf.mxu3 }
  0xca   :  { %1226 = vst [vmem:[%s1590_s3 + $0x18] sm:$0xff] %v1082_v38   ;;  %v471_v44 = vadd.f32 %v1425_v37, %v470_v40  ;;  %v511_v45 = vadd.f32 %v1425_v37, %v510_v41  ;;  %v393_v46 = vpop.f32.mrf.mxu0  ;;  %v433_v47 = vpop.f32.mrf.mxu1 }
  0xcb   :  { %1234 = vst [vmem:[%s1590_s3 + $0x58] sm:$0xff] %v1122_v39   ;;  %v394_v56 = vadd.f32 %v1425_v37, %v393_v46  ;;  %v434_v57 = vadd.f32 %v1425_v37, %v433_v47 }
  0xcc   :  { %vm572_vm15 = vcmp.ge.f32.partialorder %v471_v44, 0.0  ;;  %v636_v48 = vmul.f32 0.1, %v471_v44  ;;  %vm588_vm0 = vcmp.ge.f32.partialorder %v511_v45, 0.0  ;;  %v652_v49 = vmul.f32 0.1, %v511_v45 }
  0xcd   :  { %v605_v62 = vmul.f32 0.1, %v394_v56  ;;  %v621_v63 = vmul.f32 0.1, %v434_v57  ;;  %vm541_vm1 = vcmp.ge.f32.partialorder %v394_v56, 0.0  ;;  %vm557_vm2 = vcmp.ge.f32.partialorder %v434_v57, 0.0 }
  0xce   :  { %v700_v52 = vsel %vm572_vm15, %v471_v44, %v636_v48  ;;  %v716_v53 = vsel %vm588_vm0, %v511_v45, %v652_v49 }
  0xcf   :  { %v1162_v54 = vpack.c.bf16 %v700_v52, %v699_v50  ;;  %v1202_v55 = vpack.c.bf16 %v716_v53, %v715_v51  ;;  %v669_v6 = vsel %vm541_vm1, %v394_v56, %v605_v62  ;;  %v685_v7 = vsel %vm557_vm2, %v434_v57, %v621_v63 }
  0xd1   :  { %1242 = vst [vmem:[%s1590_s3 + $0x98] sm:$0xff] %v1162_v54   ;;  %v473_v58 = vpop.f32.mrf.mxu2  ;;  %v513_v59 = vpop.f32.mrf.mxu3 }
  0xd2   :  { %1250 = vst [vmem:[%s1590_s3 + $0xd8] sm:$0xff] %v1202_v55   ;;  %v395_v60 = vpop.f32.mrf.mxu0  ;;  %v435_v61 = vpop.f32.mrf.mxu1  ;;  %v474_v4 = vadd.f32 %v1425_v37, %v473_v58  ;;  %v514_v5 = vadd.f32 %v1425_v37, %v513_v59 }
  0xd3   :  { %v396_v0 = vadd.f32 %v1425_v37, %v395_v60  ;;  %v436_v1 = vadd.f32 %v1425_v37, %v435_v61 }
  0xd4   :  { %v637_v14 = vmul.f32 0.1, %v474_v4  ;;  %v653_v15 = vmul.f32 0.1, %v514_v5  ;;  %vm573_vm5 = vcmp.ge.f32.partialorder %v474_v4, 0.0  ;;  %vm589_vm6 = vcmp.ge.f32.partialorder %v514_v5, 0.0 }
  0xd5   :  { %vm542_vm3 = vcmp.ge.f32.partialorder %v396_v0, 0.0  ;;  %v606_v2 = vmul.f32 0.1, %v396_v0  ;;  %vm558_vm4 = vcmp.ge.f32.partialorder %v436_v1, 0.0  ;;  %v622_v3 = vmul.f32 0.1, %v436_v1 }
  0xd6   :  { %v701_v22 = vsel %vm573_vm5, %v474_v4, %v637_v14  ;;  %v717_v23 = vsel %vm589_vm6, %v514_v5, %v653_v15 }
  0xd7   :  { %v670_v8 = vsel %vm542_vm3, %v396_v0, %v606_v2  ;;  %v686_v9 = vsel %vm558_vm4, %v436_v1, %v622_v3 }
  0xd8   :  { %v1087_v10 = vpack.c.bf16 %v670_v8, %v669_v6  ;;  %v1127_v11 = vpack.c.bf16 %v686_v9, %v685_v7 }
  0xd9   :  { %v475_v12 = vpop.f32.mrf.mxu2  ;;  %v515_v13 = vpop.f32.mrf.mxu3 }
  0xda   :  { %1227 = vst [vmem:[%s1590_s3 + $0x20] sm:$0xff] %v1087_v10   ;;  %v476_v16 = vadd.f32 %v1425_v37, %v475_v12  ;;  %v516_v17 = vadd.f32 %v1425_v37, %v515_v13  ;;  %v398_v18 = vpop.f32.mrf.mxu0  ;;  %v438_v19 = vpop.f32.mrf.mxu1 }
  0xdb   :  { %1235 = vst [vmem:[%s1590_s3 + $0x60] sm:$0xff] %v1127_v11   ;;  %v399_v28 = vadd.f32 %v1425_v37, %v398_v18  ;;  %v439_v29 = vadd.f32 %v1425_v37, %v438_v19 }
  0xdc   :  { %vm574_vm7 = vcmp.ge.f32.partialorder %v476_v16, 0.0  ;;  %v638_v20 = vmul.f32 0.1, %v476_v16  ;;  %vm590_vm8 = vcmp.ge.f32.partialorder %v516_v17, 0.0  ;;  %v654_v21 = vmul.f32 0.1, %v516_v17 }
  0xdd   :  { %v607_v34 = vmul.f32 0.1, %v399_v28  ;;  %v623_v35 = vmul.f32 0.1, %v439_v29  ;;  %vm543_vm9 = vcmp.ge.f32.partialorder %v399_v28, 0.0  ;;  %vm559_vm10 = vcmp.ge.f32.partialorder %v439_v29, 0.0 }
  0xde   :  { %v702_v24 = vsel %vm574_vm7, %v476_v16, %v638_v20  ;;  %v718_v25 = vsel %vm590_vm8, %v516_v17, %v654_v21 }
  0xdf   :  { %v1167_v26 = vpack.c.bf16 %v702_v24, %v701_v22  ;;  %v1207_v27 = vpack.c.bf16 %v718_v25, %v717_v23  ;;  %v671_v43 = vsel %vm543_vm9, %v399_v28, %v607_v34  ;;  %v687_v44 = vsel %vm559_vm10, %v439_v29, %v623_v35 }
  0xe1   :  { %1243 = vst [vmem:[%s1590_s3 + $0xa0] sm:$0xff] %v1167_v26   ;;  %v478_v30 = vpop.f32.mrf.mxu2  ;;  %v518_v31 = vpop.f32.mrf.mxu3 }
  0xe2   :  { %1251 = vst [vmem:[%s1590_s3 + $0xe0] sm:$0xff] %v1207_v27   ;;  %v400_v32 = vpop.f32.mrf.mxu0  ;;  %v440_v33 = vpop.f32.mrf.mxu1  ;;  %v479_v41 = vadd.f32 %v1425_v37, %v478_v30  ;;  %v519_v42 = vadd.f32 %v1425_v37, %v518_v31 }
  0xe3   :  { %v401_v36 = vadd.f32 %v1425_v37, %v400_v32  ;;  %v441_v38 = vadd.f32 %v1425_v37, %v440_v33 }
  0xe4   :  { %v639_v51 = vmul.f32 0.1, %v479_v41  ;;  %v655_v52 = vmul.f32 0.1, %v519_v42  ;;  %vm575_vm13 = vcmp.ge.f32.partialorder %v479_v41, 0.0  ;;  %vm591_vm14 = vcmp.ge.f32.partialorder %v519_v42, 0.0 }
  0xe5   :  { %vm544_vm11 = vcmp.ge.f32.partialorder %v401_v36, 0.0  ;;  %v608_v39 = vmul.f32 0.1, %v401_v36  ;;  %vm560_vm12 = vcmp.ge.f32.partialorder %v441_v38, 0.0  ;;  %v624_v40 = vmul.f32 0.1, %v441_v38 }
  0xe6   :  { %v703_v59 = vsel %vm575_vm13, %v479_v41, %v639_v51  ;;  %v719_v60 = vsel %vm591_vm14, %v519_v42, %v655_v52 }
  0xe7   :  { %v672_v45 = vsel %vm544_vm11, %v401_v36, %v608_v39  ;;  %v688_v46 = vsel %vm560_vm12, %v441_v38, %v624_v40 }
  0xe8   :  { %v1092_v47 = vpack.c.bf16 %v672_v45, %v671_v43  ;;  %v1132_v48 = vpack.c.bf16 %v688_v46, %v687_v44 }
  0xe9   :  { %v480_v49 = vpop.f32.mrf.mxu2  ;;  %v520_v50 = vpop.f32.mrf.mxu3 }
  0xea   :  { %1228 = vst [vmem:[%s1590_s3 + $0x28] sm:$0xff] %v1092_v47   ;;  %v481_v53 = vadd.f32 %v1425_v37, %v480_v49  ;;  %v521_v54 = vadd.f32 %v1425_v37, %v520_v50  ;;  %v403_v55 = vpop.f32.mrf.mxu0  ;;  %v443_v56 = vpop.f32.mrf.mxu1 }
  0xeb   :  { %1236 = vst [vmem:[%s1590_s3 + $0x68] sm:$0xff] %v1132_v48   ;;  %v404_v1 = vadd.f32 %v1425_v37, %v403_v55  ;;  %v444_v2 = vadd.f32 %v1425_v37, %v443_v56 }
  0xec   :  { %vm576_vm15 = vcmp.ge.f32.partialorder %v481_v53, 0.0  ;;  %v640_v57 = vmul.f32 0.1, %v481_v53  ;;  %vm592_vm0 = vcmp.ge.f32.partialorder %v521_v54, 0.0  ;;  %v656_v58 = vmul.f32 0.1, %v521_v54 }
  0xed   :  { %v609_v7 = vmul.f32 0.1, %v404_v1  ;;  %v625_v8 = vmul.f32 0.1, %v444_v2  ;;  %vm545_vm1 = vcmp.ge.f32.partialorder %v404_v1, 0.0  ;;  %vm561_vm2 = vcmp.ge.f32.partialorder %v444_v2, 0.0 }
  0xee   :  { %v704_v61 = vsel %vm576_vm15, %v481_v53, %v640_v57  ;;  %v720_v62 = vsel %vm592_vm0, %v521_v54, %v656_v58 }
  0xef   :  { %v1172_v63 = vpack.c.bf16 %v704_v61, %v703_v59  ;;  %v1212_v0 = vpack.c.bf16 %v720_v62, %v719_v60  ;;  %v673_v15 = vsel %vm545_vm1, %v404_v1, %v609_v7  ;;  %v689_v16 = vsel %vm561_vm2, %v444_v2, %v625_v8 }
  0xf1   :  { %1244 = vst [vmem:[%s1590_s3 + $0xa8] sm:$0xff] %v1172_v63   ;;  %v483_v3 = vpop.f32.mrf.mxu2  ;;  %v523_v4 = vpop.f32.mrf.mxu3 }
  0xf2   :  { %1252 = vst [vmem:[%s1590_s3 + $0xe8] sm:$0xff] %v1212_v0   ;;  %v405_v5 = vpop.f32.mrf.mxu0  ;;  %v445_v6 = vpop.f32.mrf.mxu1  ;;  %v484_v13 = vadd.f32 %v1425_v37, %v483_v3  ;;  %v524_v14 = vadd.f32 %v1425_v37, %v523_v4 }
  0xf3   :  { %v406_v9 = vadd.f32 %v1425_v37, %v405_v5  ;;  %v446_v10 = vadd.f32 %v1425_v37, %v445_v6 }
  0xf4   :  { %v641_v23 = vmul.f32 0.1, %v484_v13  ;;  %v657_v24 = vmul.f32 0.1, %v524_v14  ;;  %vm577_vm5 = vcmp.ge.f32.partialorder %v484_v13, 0.0  ;;  %vm593_vm6 = vcmp.ge.f32.partialorder %v524_v14, 0.0 }
  0xf5   :  { %vm546_vm3 = vcmp.ge.f32.partialorder %v406_v9, 0.0  ;;  %v610_v11 = vmul.f32 0.1, %v406_v9  ;;  %vm562_vm4 = vcmp.ge.f32.partialorder %v446_v10, 0.0  ;;  %v626_v12 = vmul.f32 0.1, %v446_v10 }
  0xf6   :  { %v705_v31 = vsel %vm577_vm5, %v484_v13, %v641_v23  ;;  %v721_v32 = vsel %vm593_vm6, %v524_v14, %v657_v24 }
  0xf7   :  { %v674_v17 = vsel %vm546_vm3, %v406_v9, %v610_v11  ;;  %v690_v18 = vsel %vm562_vm4, %v446_v10, %v626_v12 }
  0xf8   :  { %v1097_v19 = vpack.c.bf16 %v674_v17, %v673_v15  ;;  %v1137_v20 = vpack.c.bf16 %v690_v18, %v689_v16 }
  0xf9   :  { %v485_v21 = vpop.f32.mrf.mxu2  ;;  %v525_v22 = vpop.f32.mrf.mxu3 }
  0xfa   :  { %1229 = vst [vmem:[%s1590_s3 + $0x30] sm:$0xff] %v1097_v19   ;;  %v486_v25 = vadd.f32 %v1425_v37, %v485_v21  ;;  %v526_v26 = vadd.f32 %v1425_v37, %v525_v22  ;;  %v408_v27 = vpop.f32.mrf.mxu0  ;;  %v448_v28 = vpop.f32.mrf.mxu1 }
  0xfb   :  { %1237 = vst [vmem:[%s1590_s3 + $0x70] sm:$0xff] %v1137_v20   ;;  %v409_v38 = vadd.f32 %v1425_v37, %v408_v27  ;;  %v449_v39 = vadd.f32 %v1425_v37, %v448_v28 }
  0xfc   :  { %vm578_vm7 = vcmp.ge.f32.partialorder %v486_v25, 0.0  ;;  %v642_v29 = vmul.f32 0.1, %v486_v25  ;;  %vm594_vm8 = vcmp.ge.f32.partialorder %v526_v26, 0.0  ;;  %v658_v30 = vmul.f32 0.1, %v526_v26 }
  0xfd   :  { %v611_v44 = vmul.f32 0.1, %v409_v38  ;;  %v627_v45 = vmul.f32 0.1, %v449_v39  ;;  %vm547_vm9 = vcmp.ge.f32.partialorder %v409_v38, 0.0  ;;  %vm563_vm10 = vcmp.ge.f32.partialorder %v449_v39, 0.0 }
  0xfe   :  { %v706_v33 = vsel %vm578_vm7, %v486_v25, %v642_v29  ;;  %v722_v34 = vsel %vm594_vm8, %v526_v26, %v658_v30 }
  0xff   :  { %v1177_v35 = vpack.c.bf16 %v706_v33, %v705_v31  ;;  %v1217_v36 = vpack.c.bf16 %v722_v34, %v721_v32  ;;  %v675_v52 = vsel %vm547_vm9, %v409_v38, %v611_v44  ;;  %v691_v53 = vsel %vm563_vm10, %v449_v39, %v627_v45 }
 0x101   :  { %1245 = vst [vmem:[%s1590_s3 + $0xb0] sm:$0xff] %v1177_v35   ;;  %v488_v40 = vpop.f32.mrf.mxu2  ;;  %v528_v41 = vpop.f32.mrf.mxu3 }
 0x102   :  { %1253 = vst [vmem:[%s1590_s3 + $0xf0] sm:$0xff] %v1217_v36   ;;  %v410_v42 = vpop.f32.mrf.mxu0  ;;  %v450_v43 = vpop.f32.mrf.mxu1  ;;  %v489_v50 = vadd.f32 %v1425_v37, %v488_v40  ;;  %v529_v51 = vadd.f32 %v1425_v37, %v528_v41 }
 0x103   :  { %v411_v46 = vadd.f32 %v1425_v37, %v410_v42  ;;  %v451_v47 = vadd.f32 %v1425_v37, %v450_v43 }
 0x104   :  { %v643_v60 = vmul.f32 0.1, %v489_v50  ;;  %v659_v61 = vmul.f32 0.1, %v529_v51  ;;  %vm579_vm13 = vcmp.ge.f32.partialorder %v489_v50, 0.0  ;;  %vm595_vm14 = vcmp.ge.f32.partialorder %v529_v51, 0.0 }
 0x105   :  { %vm548_vm11 = vcmp.ge.f32.partialorder %v411_v46, 0.0  ;;  %v612_v48 = vmul.f32 0.1, %v411_v46  ;;  %vm564_vm12 = vcmp.ge.f32.partialorder %v451_v47, 0.0  ;;  %v628_v49 = vmul.f32 0.1, %v451_v47 }
 0x106   :  { %v707_v2 = vsel %vm579_vm13, %v489_v50, %v643_v60  ;;  %v723_v3 = vsel %vm595_vm14, %v529_v51, %v659_v61 }
 0x107   :  { %v676_v54 = vsel %vm548_vm11, %v411_v46, %v612_v48  ;;  %v692_v55 = vsel %vm564_vm12, %v451_v47, %v628_v49 }
 0x108   :  { %v1102_v56 = vpack.c.bf16 %v676_v54, %v675_v52  ;;  %v1142_v57 = vpack.c.bf16 %v692_v55, %v691_v53 }
 0x109   :  { %v490_v58 = vpop.f32.mrf.mxu2  ;;  %v530_v59 = vpop.f32.mrf.mxu3 }
 0x10a   :  { %1230 = vst [vmem:[%s1590_s3 + $0x38] sm:$0xff] %v1102_v56   ;;  %v491_v62 = vadd.f32 %v1425_v37, %v490_v58  ;;  %v531_v63 = vadd.f32 %v1425_v37, %v530_v59 }
 0x10b   :  { %1238 = vst [vmem:[%s1590_s3 + $0x78] sm:$0xff] %v1142_v57  }
 0x10c   :  { %vm580_vm15 = vcmp.ge.f32.partialorder %v491_v62, 0.0  ;;  %v644_v0 = vmul.f32 0.1, %v491_v62  ;;  %vm596_vm0 = vcmp.ge.f32.partialorder %v531_v63, 0.0  ;;  %v660_v1 = vmul.f32 0.1, %v531_v63 }
 0x10e   :  { %v708_v4 = vsel %vm580_vm15, %v491_v62, %v644_v0  ;;  %v724_v5 = vsel %vm596_vm0, %v531_v63, %v660_v1 }
 0x10f   :  { %v1182_v6 = vpack.c.bf16 %v708_v4, %v707_v2  ;;  %v1222_v7 = vpack.c.bf16 %v724_v5, %v723_v3 }
 0x111   :  { %1246 = vst [vmem:[%s1590_s3 + $0xb8] sm:$0xff] %v1182_v6  }
 0x112   :  { %1254 = vst [vmem:[%s1590_s3 + $0xf8] sm:$0xff] %v1222_v7  }

// kernel: _lambda_.7
= control target key start
LH: loop header
LB: loop body
LE: loop exit
PB: predicated region body
PF: predicated region fallthrough
CT: control target
= control target key end

     0   :  { %s857_s1 = inlined_call_operand.vmem [shape: bf16[256,128], index: 1, kind: input, shape index: {}]   ;;  %s858_s2 = inlined_call_operand.vmem [shape: f32[1,128], index: 2, kind: input, shape index: {}]   ;;  %s859_s0 = inlined_call_operand.vmem [shape: bf16[128,256], index: 0, kind: input, shape index: {}]   ;;  %s860_s3 = inlined_call_operand.vmem [shape: bf16[128,128], index: 3, kind: output, shape index: {}]  }
   0x1   :  { %v575_v0 = vld [vmem:[%s857_s1 + $0x38] sm:$0xff]  ;;  %v574_v2 = vld [vmem:[%s857_s1 + $0x30] sm:$0xff]  ;;  %v573_v4 = vld [vmem:[%s857_s1 + $0x28] sm:$0xff] }
   0x2   :  { %v583_v1 = vld [vmem:[%s857_s1 + $0x78] sm:$0xff]  ;;  %242 = vmatpush.bf16.msra.mxu0 %v575_v0  ;;  %631 = vmatpush.bf16.msra.mxu2 %v575_v0  ;;  %v582_v3 = vld [vmem:[%s857_s1 + $0x70] sm:$0xff]  ;;  %v581_v5 = vld [vmem:[%s857_s1 + $0x68] sm:$0xff] }
   0x3   :  { %291 = vmatpush.bf16.msra.mxu1 %v583_v1  ;;  %639 = vmatpush.bf16.msra.mxu3 %v583_v1  ;;  %v572_v6 = vld [vmem:[%s857_s1 + $0x20] sm:$0xff]  ;;  %v571_v8 = vld [vmem:[%s857_s1 + $0x18] sm:$0xff]  ;;  %v570_v10 = vld [vmem:[%s857_s1 + $0x10] sm:$0xff] }
   0x4   :  { %v580_v7 = vld [vmem:[%s857_s1 + $0x60] sm:$0xff]  ;;  %v579_v9 = vld [vmem:[%s857_s1 + $0x58] sm:$0xff]  ;;  %v578_v11 = vld [vmem:[%s857_s1 + $0x50] sm:$0xff] }
   0x5   :  { %v569_v12 = vld [vmem:[%s857_s1 + $0x8] sm:$0xff]  ;;  %v568_v14 = vld [vmem:[%s857_s1] sm:$0xff]  ;;  %v434_v28 = vld [vmem:[%s859_s0 + $0x10] sm:$0xf] }
   0x6   :  { %243 = vmatpush.bf16.msra.mxu0 %v574_v2  ;;  %632 = vmatpush.bf16.msra.mxu2 %v574_v2  ;;  %v577_v13 = vld [vmem:[%s857_s1 + $0x48] sm:$0xff]  ;;  %v576_v15 = vld [vmem:[%s857_s1 + $0x40] sm:$0xff]  ;;  %v555_v29 = vld [vmem:[%s859_s0 + $0x14] sm:$0xf0] }
   0x7   :  { %292 = vmatpush.bf16.msra.mxu1 %v582_v3  ;;  %640 = vmatpush.bf16.msra.mxu3 %v582_v3  ;;  %v426_v16 = vld [vmem:[%s859_s0] sm:$0xf]  ;;  %v553_v17 = vld [vmem:[%s859_s0 + $0x4] sm:$0xf0]  ;;  %v552_v20 = vld [vmem:[%s859_s0 + $0x4] sm:$0xf]  ;;  %v435_v36 = vor.u32 %v555_v29, %v434_v28 }
   0x8   :  { %v458_v18 = vld [vmem:[%s859_s0 + $0x40] sm:$0xf]  ;;  %v561_v19 = vld [vmem:[%s859_s0 + $0x44] sm:$0xf0]  ;;  %v428_v21 = vld [vmem:[%s859_s0 + $0x8] sm:$0xf0]  ;;  %v427_v24 = vor.u32 %v553_v17, %v426_v16 }
   0x9   :  { %v560_v22 = vld [vmem:[%s859_s0 + $0x44] sm:$0xf]  ;;  %v460_v23 = vld [vmem:[%s859_s0 + $0x48] sm:$0xf0]  ;;  %v459_v25 = vor.u32 %v561_v19, %v458_v18  ;;  %v431_v26 = vor.u32 %v552_v20, %v428_v21  ;;  %v466_v30 = vld [vmem:[%s859_s0 + $0x50] sm:$0xf] }
   0xa   :  { %244 = vmatpush.bf16.msra.mxu0 %v573_v4  ;;  %633 = vmatpush.bf16.msra.mxu2 %v573_v4  ;;  %v463_v27 = vor.u32 %v560_v22, %v460_v23  ;;  %v563_v31 = vld [vmem:[%s859_s0 + $0x54] sm:$0xf0]  ;;  %v554_v32 = vld [vmem:[%s859_s0 + $0x14] sm:$0xf]  ;;  %v436_v33 = vld [vmem:[%s859_s0 + $0x18] sm:$0xf0] }
   0xb   :  { %293 = vmatpush.bf16.msra.mxu1 %v581_v5  ;;  %641 = vmatpush.bf16.msra.mxu3 %v581_v5  ;;  %v562_v34 = vld [vmem:[%s859_s0 + $0x54] sm:$0xf]  ;;  %v468_v35 = vld [vmem:[%s859_s0 + $0x58] sm:$0xf0]  ;;  %v467_v37 = vor.u32 %v563_v31, %v466_v30  ;;  %v439_v38 = vor.u32 %v554_v32, %v436_v33  ;;  %v442_v40 = vld [vmem:[%s859_s0 + $0x20] sm:$0xf] }
   0xc   :  { %v471_v39 = vor.u32 %v562_v34, %v468_v35  ;;  %v557_v41 = vld [vmem:[%s859_s0 + $0x24] sm:$0xf0]  ;;  %v474_v42 = vld [vmem:[%s859_s0 + $0x60] sm:$0xf]  ;;  %v556_v44 = vld [vmem:[%s859_s0 + $0x24] sm:$0xf] }
   0xd   :  { %v565_v43 = vld [vmem:[%s859_s0 + $0x64] sm:$0xf0]  ;;  %v444_v45 = vld [vmem:[%s859_s0 + $0x28] sm:$0xf0]  ;;  %v564_v46 = vld [vmem:[%s859_s0 + $0x64] sm:$0xf]  ;;  %v443_v48 = vor.u32 %v557_v41, %v442_v40 }
   0xe   :  { %245 = vmatpush.bf16.msra.mxu0 %v572_v6  ;;  %634 = vmatpush.bf16.msra.mxu2 %v572_v6  ;;  %v476_v47 = vld [vmem:[%s859_s0 + $0x68] sm:$0xf0]  ;;  %v475_v49 = vor.u32 %v565_v43, %v474_v42  ;;  %v447_v50 = vor.u32 %v556_v44, %v444_v45  ;;  %v450_v52 = vld [vmem:[%s859_s0 + $0x30] sm:$0xf]  ;;  %v559_v53 = vld [vmem:[%s859_s0 + $0x34] sm:$0xf0] }
   0xf   :  { %294 = vmatpush.bf16.msra.mxu1 %v580_v7  ;;  %642 = vmatpush.bf16.msra.mxu3 %v580_v7  ;;  %v479_v51 = vor.u32 %v564_v46, %v476_v47  ;;  %v482_v54 = vld [vmem:[%s859_s0 + $0x70] sm:$0xf]  ;;  %v567_v55 = vld [vmem:[%s859_s0 + $0x74] sm:$0xf0]  ;;  %v558_v56 = vld [vmem:[%s859_s0 + $0x34] sm:$0xf]  ;;  %v451_v60 = vor.u32 %v559_v53, %v450_v52 }
  0x10   :  { %v452_v57 = vld [vmem:[%s859_s0 + $0x38] sm:$0xf0]  ;;  %v566_v58 = vld [vmem:[%s859_s0 + $0x74] sm:$0xf]  ;;  %v483_v61 = vor.u32 %v567_v55, %v482_v54  ;;  %v815_v0 = vld [vmem:[%s858_s2] ss:$0 sm:$0xff] }
  0x11   :  { %v484_v59 = vld [vmem:[%s859_s0 + $0x78] sm:$0xf0]  ;;  %v455_v62 = vor.u32 %v558_v56, %v452_v57 }
  0x12   :  { %246 = vmatpush.bf16.msra.mxu0 %v571_v8  ;;  %635 = vmatpush.bf16.msra.mxu2 %v571_v8  ;;  %v487_v63 = vor.u32 %v566_v58, %v484_v59 }
  0x13   :  { %295 = vmatpush.bf16.msra.mxu1 %v579_v9  ;;  %643 = vmatpush.bf16.msra.mxu3 %v579_v9 }
  0x16   :  { %247 = vmatpush.bf16.msra.mxu0 %v570_v10  ;;  %636 = vmatpush.bf16.msra.mxu2 %v570_v10 }
  0x17   :  { %296 = vmatpush.bf16.msra.mxu1 %v578_v11  ;;  %644 = vmatpush.bf16.msra.mxu3 %v578_v11 }
  0x1a   :  { %248 = vmatpush.bf16.msra.mxu0 %v569_v12  ;;  %637 = vmatpush.bf16.msra.mxu2 %v569_v12 }
  0x1b   :  { %297 = vmatpush.bf16.msra.mxu1 %v577_v13  ;;  %645 = vmatpush.bf16.msra.mxu3 %v577_v13 }
  0x1e   :  { %249 = vmatpush.bf16.msra.mxu0 %v568_v14  ;;  %638 = vmatpush.bf16.msra.mxu2 %v568_v14 }
  0x1f   :  { %298 = vmatpush.bf16.msra.mxu1 %v576_v15  ;;  %646 = vmatpush.bf16.msra.mxu3 %v576_v15 }
  0x21   :  { %250 = vmatmul.bf16.vlgmr.msra.gmra.mxu0 %v427_v24  ;;  %270 = vmatmul.bf16.vlgmr.msra.gmra.mxu2 %v459_v25 }
  0x22   :  { %299 = vmatmul.bf16.vlgmr.msra.gmra.mxu1 %v431_v26  ;;  %319 = vmatmul.bf16.vlgmr.msra.gmra.mxu3 %v463_v27 }
  0x31   :  { %255 = vmatmul.bf16.gmra.mxu0 %v435_v36  ;;  %275 = vmatmul.bf16.gmra.mxu2 %v467_v37 }
  0x32   :  { %304 = vmatmul.bf16.gmra.mxu1 %v439_v38  ;;  %324 = vmatmul.bf16.gmra.mxu3 %v471_v39 }
  0x41   :  { %260 = vmatmul.bf16.gmra.mxu0 %v443_v48  ;;  %280 = vmatmul.bf16.gmra.mxu2 %v475_v49 }
  0x42   :  { %309 = vmatmul.bf16.gmra.mxu1 %v447_v50  ;;  %329 = vmatmul.bf16.gmra.mxu3 %v479_v51 }
  0x51   :  { %265 = vmatmul.bf16.gmra.mxu0 %v451_v60  ;;  %285 = vmatmul.bf16.gmra.mxu2 %v483_v61 }
  0x52   :  { %314 = vmatmul.bf16.gmra.mxu1 %v455_v62  ;;  %334 = vmatmul.bf16.gmra.mxu3 %v487_v63 }
  0x9e   :  { %v251_v1 = vpop.f32.mrf.mxu0 }
  0x9f   :  { %v300_v2 = vpop.f32.mrf.mxu1  ;;  %v252_v3 = vadd.f32 %v815_v0, %v251_v1 }
  0xa1   :  { %v301_v5 = vadd.f32 %v300_v2, %v252_v3 }
  0xa3   :  { %v356_v11 = vmul.f32 0.1, %v301_v5  ;;  %vm340_vm0 = vcmp.ge.f32.partialorder %v301_v5, 0.0 }
  0xa4   :  { %v271_v4 = vpop.f32.mrf.mxu2 }
  0xa5   :  { %v320_v6 = vpop.f32.mrf.mxu3  ;;  %v272_v8 = vadd.f32 %v815_v0, %v271_v4  ;;  %v372_v16 = vsel %vm340_vm0, %v301_v5, %v356_v11 }
  0xa6   :  { %v253_v7 = vpop.f32.mrf.mxu0 }
  0xa7   :  { %v254_v9 = vadd.f32 %v815_v0, %v253_v7  ;;  %v302_v10 = vpop.f32.mrf.mxu1  ;;  %v321_v13 = vadd.f32 %v320_v6, %v272_v8 }
  0xa9   :  { %v303_v12 = vadd.f32 %v302_v10, %v254_v9  ;;  %v364_v22 = vmul.f32 0.1, %v321_v13  ;;  %vm348_vm2 = vcmp.ge.f32.partialorder %v321_v13, 0.0 }
  0xab   :  { %vm341_vm1 = vcmp.ge.f32.partialorder %v303_v12, 0.0  ;;  %v357_v14 = vmul.f32 0.1, %v303_v12  ;;  %v380_v27 = vsel %vm348_vm2, %v321_v13, %v364_v22 }
  0xac   :  { %v273_v15 = vpop.f32.mrf.mxu2 }
  0xad   :  { %v373_v17 = vsel %vm341_vm1, %v303_v12, %v357_v14  ;;  %v274_v18 = vadd.f32 %v815_v0, %v273_v15  ;;  %v322_v19 = vpop.f32.mrf.mxu3 }
  0xae   :  { %v587_v20 = vpack.c.bf16 %v373_v17, %v372_v16  ;;  %v256_v21 = vpop.f32.mrf.mxu0 }
  0xaf   :  { %v323_v23 = vadd.f32 %v322_v19, %v274_v18  ;;  %v305_v24 = vpop.f32.mrf.mxu1  ;;  %v257_v26 = vadd.f32 %v815_v0, %v256_v21 }
  0xb0   :  { %588 = vst [vmem:[%s860_s3] sm:$0xff] %v587_v20  }
  0xb1   :  { %vm349_vm3 = vcmp.ge.f32.partialorder %v323_v23, 0.0  ;;  %v365_v25 = vmul.f32 0.1, %v323_v23  ;;  %v306_v31 = vadd.f32 %v305_v24, %v257_v26 }
  0xb3   :  { %v381_v28 = vsel %vm349_vm3, %v323_v23, %v365_v25  ;;  %v358_v37 = vmul.f32 0.1, %v306_v31  ;;  %vm342_vm4 = vcmp.ge.f32.partialorder %v306_v31, 0.0 }
  0xb4   :  { %v607_v29 = vpack.c.bf16 %v381_v28, %v380_v27  ;;  %v276_v30 = vpop.f32.mrf.mxu2 }
  0xb5   :  { %v325_v32 = vpop.f32.mrf.mxu3  ;;  %v277_v34 = vadd.f32 %v815_v0, %v276_v30  ;;  %v374_v42 = vsel %vm342_vm4, %v306_v31, %v358_v37 }
  0xb6   :  { %627 = vst [vmem:[%s860_s3 + $0x20] sm:$0xff] %v607_v29   ;;  %v258_v33 = vpop.f32.mrf.mxu0 }
  0xb7   :  { %v259_v35 = vadd.f32 %v815_v0, %v258_v33  ;;  %v307_v36 = vpop.f32.mrf.mxu1  ;;  %v326_v39 = vadd.f32 %v325_v32, %v277_v34 }
  0xb9   :  { %v308_v38 = vadd.f32 %v307_v36, %v259_v35  ;;  %v366_v48 = vmul.f32 0.1, %v326_v39  ;;  %vm350_vm6 = vcmp.ge.f32.partialorder %v326_v39, 0.0 }
  0xbb   :  { %vm343_vm5 = vcmp.ge.f32.partialorder %v308_v38, 0.0  ;;  %v359_v40 = vmul.f32 0.1, %v308_v38  ;;  %v382_v53 = vsel %vm350_vm6, %v326_v39, %v366_v48 }
  0xbc   :  { %v278_v41 = vpop.f32.mrf.mxu2 }
  0xbd   :  { %v375_v43 = vsel %vm343_vm5, %v308_v38, %v359_v40  ;;  %v279_v44 = vadd.f32 %v815_v0, %v278_v41  ;;  %v327_v45 = vpop.f32.mrf.mxu3 }
  0xbe   :  { %v592_v46 = vpack.c.bf16 %v375_v43, %v374_v42  ;;  %v261_v47 = vpop.f32.mrf.mxu0 }
  0xbf   :  { %v328_v49 = vadd.f32 %v327_v45, %v279_v44  ;;  %v310_v50 = vpop.f32.mrf.mxu1  ;;  %v262_v52 = vadd.f32 %v815_v0, %v261_v47 }
  0xc0   :  { %624 = vst [vmem:[%s860_s3 + $0x8] sm:$0xff] %v592_v46  }
  0xc1   :  { %vm351_vm7 = vcmp.ge.f32.partialorder %v328_v49, 0.0  ;;  %v367_v51 = vmul.f32 0.1, %v328_v49  ;;  %v311_v57 = vadd.f32 %v310_v50, %v262_v52 }
  0xc3   :  { %v383_v54 = vsel %vm351_vm7, %v328_v49, %v367_v51  ;;  %v360_v63 = vmul.f32 0.1, %v311_v57  ;;  %vm344_vm8 = vcmp.ge.f32.partialorder %v311_v57, 0.0 }
  0xc4   :  { %v612_v55 = vpack.c.bf16 %v383_v54, %v382_v53  ;;  %v281_v56 = vpop.f32.mrf.mxu2 }
  0xc5   :  { %v330_v58 = vpop.f32.mrf.mxu3  ;;  %v282_v60 = vadd.f32 %v815_v0, %v281_v56  ;;  %v376_v5 = vsel %vm344_vm8, %v311_v57, %v360_v63 }
  0xc6   :  { %628 = vst [vmem:[%s860_s3 + $0x28] sm:$0xff] %v612_v55   ;;  %v263_v59 = vpop.f32.mrf.mxu0 }
  0xc7   :  { %v264_v61 = vadd.f32 %v815_v0, %v263_v59  ;;  %v312_v62 = vpop.f32.mrf.mxu1  ;;  %v331_v2 = vadd.f32 %v330_v58, %v282_v60 }
  0xc9   :  { %v313_v1 = vadd.f32 %v312_v62, %v264_v61  ;;  %v368_v11 = vmul.f32 0.1, %v331_v2  ;;  %vm352_vm10 = vcmp.ge.f32.partialorder %v331_v2, 0.0 }
  0xcb   :  { %vm345_vm9 = vcmp.ge.f32.partialorder %v313_v1, 0.0  ;;  %v361_v3 = vmul.f32 0.1, %v313_v1  ;;  %v384_v16 = vsel %vm352_vm10, %v331_v2, %v368_v11 }
  0xcc   :  { %v283_v4 = vpop.f32.mrf.mxu2 }
  0xcd   :  { %v377_v6 = vsel %vm345_vm9, %v313_v1, %v361_v3  ;;  %v284_v7 = vadd.f32 %v815_v0, %v283_v4  ;;  %v332_v8 = vpop.f32.mrf.mxu3 }
  0xce   :  { %v597_v9 = vpack.c.bf16 %v377_v6, %v376_v5  ;;  %v266_v10 = vpop.f32.mrf.mxu0 }
  0xcf   :  { %v333_v12 = vadd.f32 %v332_v8, %v284_v7  ;;  %v315_v13 = vpop.f32.mrf.mxu1  ;;  %v267_v15 = vadd.f32 %v815_v0, %v266_v10 }
  0xd0   :  { %625 = vst [vmem:[%s860_s3 + $0x10] sm:$0xff] %v597_v9  }
  0xd1   :  { %vm353_vm11 = vcmp.ge.f32.partialorder %v333_v12, 0.0  ;;  %v369_v14 = vmul.f32 0.1, %v333_v12  ;;  %v316_v20 = vadd.f32 %v315_v13, %v267_v15 }
  0xd3   :  { %v385_v17 = vsel %vm353_vm11, %v333_v12, %v369_v14  ;;  %v362_v26 = vmul.f32 0.1, %v316_v20  ;;  %vm346_vm12 = vcmp.ge.f32.partialorder %v316_v20, 0.0 }
  0xd4   :  { %v617_v18 = vpack.c.bf16 %v385_v17, %v384_v16  ;;  %v286_v19 = vpop.f32.mrf.mxu2 }
  0xd5   :  { %v335_v21 = vpop.f32.mrf.mxu3  ;;  %v287_v23 = vadd.f32 %v815_v0, %v286_v19  ;;  %v378_v31 = vsel %vm346_vm12, %v316_v20, %v362_v26 }
  0xd6   :  { %629 = vst [vmem:[%s860_s3 + $0x30] sm:$0xff] %v617_v18   ;;  %v268_v22 = vpop.f32.mrf.mxu0 }
  0xd7   :  { %v269_v24 = vadd.f32 %v815_v0, %v268_v22  ;;  %v317_v25 = vpop.f32.mrf.mxu1  ;;  %v336_v28 = vadd.f32 %v335_v21, %v287_v23 }
  0xd9   :  { %v318_v27 = vadd.f32 %v317_v25, %v269_v24  ;;  %v370_v36 = vmul.f32 0.1, %v336_v28  ;;  %vm354_vm14 = vcmp.ge.f32.partialorder %v336_v28, 0.0 }
  0xdb   :  { %vm347_vm13 = vcmp.ge.f32.partialorder %v318_v27, 0.0  ;;  %v363_v29 = vmul.f32 0.1, %v318_v27  ;;  %v386_v39 = vsel %vm354_vm14, %v336_v28, %v370_v36 }
  0xdc   :  { %v288_v30 = vpop.f32.mrf.mxu2 }
  0xdd   :  { %v379_v32 = vsel %vm347_vm13, %v318_v27, %v363_v29  ;;  %v289_v33 = vadd.f32 %v815_v0, %v288_v30  ;;  %v337_v35 = vpop.f32.mrf.mxu3 }
  0xde   :  { %v602_v34 = vpack.c.bf16 %v379_v32, %v378_v31 }
  0xdf   :  { %v338_v37 = vadd.f32 %v337_v35, %v289_v33 }
  0xe0   :  { %626 = vst [vmem:[%s860_s3 + $0x18] sm:$0xff] %v602_v34  }
  0xe1   :  { %vm355_vm15 = vcmp.ge.f32.partialorder %v338_v37, 0.0  ;;  %v371_v38 = vmul.f32 0.1, %v338_v37 }
  0xe3   :  { %v387_v40 = vsel %vm355_vm15, %v338_v37, %v371_v38 }
  0xe4   :  { %v622_v41 = vpack.c.bf16 %v387_v40, %v386_v39 }
  0xe6   :  { %630 = vst [vmem:[%s860_s3 + $0x38] sm:$0xff] %v622_v41  }

// kernel: _lambda_.8
= control target key start
LH: loop header
LB: loop body
LE: loop exit
PB: predicated region body
PF: predicated region fallthrough
CT: control target
= control target key end

     0   :  { %vm315_vm0 = vcmask 261120   ;;  %s1136_s1 = inlined_call_operand.vmem [shape: bf16[288,128], index: 1, kind: input, shape index: {}]   ;;  %s1137_s0 = inlined_call_operand.vmem [shape: bf16[128,288], index: 0, kind: input, shape index: {}]   ;;  %s1138_s2 = inlined_call_operand.vmem [shape: f32[1,128], index: 2, kind: input, shape index: {}]   ;;  %s1139_s3 = inlined_call_operand.vmem [shape: bf16[128,128], index: 3, kind: output, shape index: {}]  }
   0x1   :  { %v778_v0 = vld [vmem:[%s1136_s1 + $0x38] sm:$0xff]  ;;  %v788_v1 = vld [vmem:[%s1136_s1 + $0x88] sm:$0xff]  ;;  %v777_v3 = vld [vmem:[%s1136_s1 + $0x30] sm:$0xff] }
   0x2   :  { %v786_v2 = vld [vmem:[%s1136_s1 + $0x78] sm:$0xff]  ;;  %340 = vmatpush.bf16.msra.mxu0 %v778_v0  ;;  %836 = vmatpush.bf16.msra.mxu3 %v778_v0  ;;  %v787_v4 = vld [vmem:[%s1136_s1 + $0x80] sm:$0xff]  ;;  %v785_v5 = vld [vmem:[%s1136_s1 + $0x70] sm:$0xff] }
   0x3   :  { %444 = vmatpush.bf16.msra.mxu2 %v788_v1  ;;  %389 = vmatpush.bf16.msra.mxu1 %v786_v2  ;;  %v581_v6 = vld [vmem:[%s1137_s0 + $0x8] sm:$0xf]  ;;  %v749_v7 = vld [vmem:[%s1137_s0 + $0x10] sm:$0xf0]  ;;  %v775_v11 = vld [vmem:[%s1136_s1 + $0x20] sm:$0xff] }
   0x4   :  { %v582_v8 = vor.u32 %v749_v7, %v581_v6  ;;  %v776_v9 = vld [vmem:[%s1136_s1 + $0x28] sm:$0xff]  ;;  %v783_v12 = vld [vmem:[%s1136_s1 + $0x60] sm:$0xff]  ;;  %v774_v13 = vld [vmem:[%s1136_s1 + $0x18] sm:$0xff] }
   0x5   :  { %v784_v10 = vld [vmem:[%s1136_s1 + $0x68] sm:$0xff]  ;;  %v782_v14 = vld [vmem:[%s1136_s1 + $0x58] sm:$0xff]  ;;  %v773_v15 = vld [vmem:[%s1136_s1 + $0x10] sm:$0xff] }
   0x6   :  { %341 = vmatpush.bf16.msra.mxu0 %v777_v3  ;;  %837 = vmatpush.bf16.msra.mxu3 %v777_v3  ;;  %v781_v16 = vld [vmem:[%s1136_s1 + $0x50] sm:$0xff]  ;;  %v593_v17 = vld [vmem:[%s1137_s0 + $0x20] sm:$0xf]  ;;  %v752_v18 = vld [vmem:[%s1137_s0 + $0x28] sm:$0xf0] }
   0x7   :  { %445 = vmatpush.bf16.msra.mxu2 %v787_v4  ;;  %390 = vmatpush.bf16.msra.mxu1 %v785_v5  ;;  %v594_v19 = vor.u32 %v752_v18, %v593_v17  ;;  %v772_v20 = vld [vmem:[%s1136_s1 + $0x8] sm:$0xff]  ;;  %v771_v22 = vld [vmem:[%s1136_s1] sm:$0xff]  ;;  %v645_v26 = vld [vmem:[%s1137_s0 + $0x90] sm:$0xf] }
   0x8   :  { %v780_v21 = vld [vmem:[%s1136_s1 + $0x48] sm:$0xff]  ;;  %v779_v23 = vld [vmem:[%s1136_s1 + $0x40] sm:$0xff]  ;;  %v766_v27 = vld [vmem:[%s1137_s0 + $0x98] sm:$0xf0] }
   0x9   :  { %v573_v24 = vld [vmem:[%s1137_s0] sm:$0xf]  ;;  %v748_v25 = vld [vmem:[%s1137_s0 + $0x8] sm:$0xf0]  ;;  %v747_v28 = vld [vmem:[%s1137_s0 + $0x4] sm:$0xf]  ;;  %v646_v31 = vor.u32 %v766_v27, %v645_v26 }
   0xa   :  { %739 = vmatmul.msk.bf16.vlgmr.msra.gmra.mxu2 %vm315_vm0, %v582_v8  ;;  %342 = vmatpush.bf16.msra.mxu0 %v776_v9  ;;  %v575_v29 = vld [vmem:[%s1137_s0 + $0xc] sm:$0xf0]  ;;  %v574_v30 = vor.u32 %v748_v25, %v573_v24  ;;  %v605_v33 = vld [vmem:[%s1137_s0 + $0x38] sm:$0xf]  ;;  %v755_v34 = vld [vmem:[%s1137_s0 + $0x40] sm:$0xf0] }
   0xb   :  { %838 = vmatpush.bf16.msra.mxu3 %v776_v9  ;;  %391 = vmatpush.bf16.msra.mxu1 %v784_v10  ;;  %v578_v32 = vor.u32 %v747_v28, %v575_v29  ;;  %v606_v35 = vor.u32 %v755_v34, %v605_v33  ;;  %v585_v36 = vld [vmem:[%s1137_s0 + $0x18] sm:$0xf]  ;;  %v751_v37 = vld [vmem:[%s1137_s0 + $0x20] sm:$0xf0]  ;;  %v657_v38 = vld [vmem:[%s1137_s0 + $0xa8] sm:$0xf] }
   0xc   :  { %v769_v39 = vld [vmem:[%s1137_s0 + $0xb0] sm:$0xf0]  ;;  %v750_v40 = vld [vmem:[%s1137_s0 + $0x1c] sm:$0xf]  ;;  %v587_v41 = vld [vmem:[%s1137_s0 + $0x24] sm:$0xf0]  ;;  %v586_v42 = vor.u32 %v751_v37, %v585_v36 }
   0xd   :  { %v658_v43 = vor.u32 %v769_v39, %v657_v38  ;;  %v590_v44 = vor.u32 %v750_v40, %v587_v41  ;;  %v617_v45 = vld [vmem:[%s1137_s0 + $0x50] sm:$0xf]  ;;  %v758_v46 = vld [vmem:[%s1137_s0 + $0x58] sm:$0xf0]  ;;  %v765_v50 = vld [vmem:[%s1137_s0 + $0x94] sm:$0xf] }
   0xe   :  { %343 = vmatpush.bf16.msra.mxu0 %v775_v11  ;;  %v618_v47 = vor.u32 %v758_v46, %v617_v45  ;;  %v597_v48 = vld [vmem:[%s1137_s0 + $0x30] sm:$0xf]  ;;  %v754_v49 = vld [vmem:[%s1137_s0 + $0x38] sm:$0xf0]  ;;  %v647_v51 = vld [vmem:[%s1137_s0 + $0x9c] sm:$0xf0] }
   0xf   :  { %839 = vmatpush.bf16.msra.mxu3 %v775_v11  ;;  %392 = vmatpush.bf16.msra.mxu1 %v783_v12  ;;  %v753_v52 = vld [vmem:[%s1137_s0 + $0x34] sm:$0xf]  ;;  %v599_v53 = vld [vmem:[%s1137_s0 + $0x3c] sm:$0xf0]  ;;  %v598_v54 = vor.u32 %v754_v49, %v597_v48  ;;  %v650_v55 = vor.u32 %v765_v50, %v647_v51  ;;  %v629_v57 = vld [vmem:[%s1137_s0 + $0x68] sm:$0xf] }
  0x10   :  { %v602_v56 = vor.u32 %v753_v52, %v599_v53  ;;  %v761_v58 = vld [vmem:[%s1137_s0 + $0x70] sm:$0xf0]  ;;  %v609_v60 = vld [vmem:[%s1137_s0 + $0x48] sm:$0xf]  ;;  %v768_v62 = vld [vmem:[%s1137_s0 + $0xac] sm:$0xf] }
  0x11   :  { %v630_v59 = vor.u32 %v761_v58, %v629_v57  ;;  %v757_v61 = vld [vmem:[%s1137_s0 + $0x50] sm:$0xf0]  ;;  %v659_v63 = vld [vmem:[%s1137_s0 + $0xb4] sm:$0xf0]  ;;  %v756_v0 = vld [vmem:[%s1137_s0 + $0x4c] sm:$0xf] }
  0x12   :  { %344 = vmatpush.bf16.msra.mxu0 %v774_v13  ;;  %v611_v1 = vld [vmem:[%s1137_s0 + $0x54] sm:$0xf0]  ;;  %v662_v3 = vor.u32 %v768_v62, %v659_v63  ;;  %v764_v6 = vld [vmem:[%s1137_s0 + $0x88] sm:$0xf0]  ;;  %v621_v8 = vld [vmem:[%s1137_s0 + $0x60] sm:$0xf] }
  0x13   :  { %840 = vmatpush.bf16.msra.mxu3 %v774_v13  ;;  %393 = vmatpush.bf16.msra.mxu1 %v782_v14  ;;  %v614_v4 = vor.u32 %v756_v0, %v611_v1  ;;  %v760_v9 = vld [vmem:[%s1137_s0 + $0x68] sm:$0xf0]  ;;  %v623_v11 = vld [vmem:[%s1137_s0 + $0x6c] sm:$0xf0]  ;;  %v633_v17 = vld [vmem:[%s1137_s0 + $0x78] sm:$0xf] }
  0x14   :  { %v763_v18 = vld [vmem:[%s1137_s0 + $0x80] sm:$0xf0]  ;;  %v770_v24 = vld [vmem:[%s1137_s0 + $0xb8] sm:$0xf0]  ;;  %v1082_v28 = vld [vmem:[%s1138_s2] ss:$0 sm:$0xff] }
  0x16   :  { %345 = vmatpush.bf16.msra.mxu0 %v773_v15 }
  0x17   :  { %841 = vmatpush.bf16.msra.mxu3 %v773_v15  ;;  %394 = vmatpush.bf16.msra.mxu1 %v781_v16  ;;  %v767_v15 = vld [vmem:[%s1137_s0 + $0xa0] sm:$0xf0] }
  0x1a   :  { %740 = vmatmul.msk.bf16.gmra.mxu2 %vm315_vm0, %v594_v19  ;;  %346 = vmatpush.bf16.msra.mxu0 %v772_v20  ;;  %v762_v19 = vld [vmem:[%s1137_s0 + $0x7c] sm:$0xf] }
  0x1b   :  { %842 = vmatpush.bf16.msra.mxu3 %v772_v20  ;;  %395 = vmatpush.bf16.msra.mxu1 %v780_v21  ;;  %v635_v20 = vld [vmem:[%s1137_s0 + $0x84] sm:$0xf0] }
  0x1e   :  { %347 = vmatpush.bf16.msra.mxu0 %v771_v22 }
  0x1f   :  { %843 = vmatpush.bf16.msra.mxu3 %v771_v22  ;;  %396 = vmatpush.bf16.msra.mxu1 %v779_v23  ;;  %v638_v22 = vor.u32 %v762_v19, %v635_v20 }
  0x21   :  { %348 = vmatmul.bf16.vlgmr.msra.gmra.mxu0 %v574_v30 }
  0x22   :  { %378 = vmatmul.bf16.vlgmr.msra.gmra.mxu3 %v646_v31  ;;  %397 = vmatmul.bf16.vlgmr.msra.gmra.mxu1 %v578_v32 }
  0x23   :  { %844 = vmatpush.bf16.msrb.mxu3 %v786_v2  ;;  %v610_v2 = vor.u32 %v757_v61, %v609_v60 }
  0x27   :  { %845 = vmatpush.bf16.msrb.mxu3 %v785_v5  ;;  %v641_v5 = vld [vmem:[%s1137_s0 + $0x80] sm:$0xf] }
  0x28   :  { %v642_v7 = vor.u32 %v764_v6, %v641_v5 }
  0x2a   :  { %741 = vmatmul.msk.bf16.gmra.mxu2 %vm315_vm0, %v606_v35 }
  0x2b   :  { %846 = vmatpush.bf16.msrb.mxu3 %v784_v10  ;;  %v759_v10 = vld [vmem:[%s1137_s0 + $0x64] sm:$0xf] }
  0x2c   :  { %v626_v13 = vor.u32 %v759_v10, %v623_v11 }
  0x2f   :  { %847 = vmatpush.bf16.msrb.mxu3 %v783_v12  ;;  %v622_v12 = vor.u32 %v760_v9, %v621_v8 }
  0x31   :  { %353 = vmatmul.bf16.gmra.mxu0 %v586_v42 }
  0x32   :  { %383 = vmatmul.bf16.gmra.mxu3 %v658_v43  ;;  %402 = vmatmul.bf16.gmra.mxu1 %v590_v44 }
  0x33   :  { %848 = vmatpush.bf16.msrb.mxu3 %v782_v14  ;;  %v653_v14 = vld [vmem:[%s1137_s0 + $0x98] sm:$0xf] }
  0x37   :  { %849 = vmatpush.bf16.msrb.mxu3 %v781_v16  ;;  %v654_v16 = vor.u32 %v767_v15, %v653_v14 }
  0x3a   :  { %742 = vmatmul.msk.bf16.gmra.mxu2 %vm315_vm0, %v618_v47 }
  0x3b   :  { %850 = vmatpush.bf16.msrb.mxu3 %v780_v21  ;;  %v634_v21 = vor.u32 %v763_v18, %v633_v17 }
  0x3f   :  { %851 = vmatpush.bf16.msrb.mxu3 %v779_v23  ;;  %v665_v23 = vld [vmem:[%s1137_s0 + $0xb0] sm:$0xf] }
  0x40   :  { %v666_v25 = vor.u32 %v770_v24, %v665_v23 }
  0x41   :  { %358 = vmatmul.bf16.gmra.mxu0 %v598_v54 }
  0x42   :  { %427 = vmatmul.bf16.vlgmr.msrb.gmra.mxu3 %v650_v55  ;;  %407 = vmatmul.bf16.gmra.mxu1 %v602_v56 }
  0x4a   :  { %743 = vmatmul.msk.bf16.gmra.mxu2 %vm315_vm0, %v630_v59 }
  0x51   :  { %363 = vmatmul.bf16.gmra.mxu0 %v610_v2 }
  0x52   :  { %432 = vmatmul.bf16.gmra.mxu3 %v662_v3  ;;  %412 = vmatmul.bf16.gmra.mxu1 %v614_v4 }
  0x5a   :  { %744 = vmatmul.msk.bf16.gmra.mxu2 %vm315_vm0, %v642_v7 }
  0x61   :  { %368 = vmatmul.bf16.gmra.mxu0 %v622_v12 }
  0x62   :  { %417 = vmatmul.bf16.gmra.mxu1 %v626_v13 }
  0x6a   :  { %745 = vmatmul.msk.bf16.gmra.mxu2 %vm315_vm0, %v654_v16 }
  0x71   :  { %373 = vmatmul.bf16.gmra.mxu0 %v634_v21 }
  0x72   :  { %422 = vmatmul.bf16.gmra.mxu1 %v638_v22 }
  0x7a   :  { %746 = vmatmul.msk.bf16.gmra.mxu2 %vm315_vm0, %v666_v25 }
  0x8d   :  { %v447_v26 = vpop.f32.mrf.mxu2 }
  0x95   :  { %v449_v27 = vpop.f32.mrf.mxu2 }
  0x9d   :  { %v452_v29 = vpop.f32.mrf.mxu2 }
  0x9e   :  { %v349_v30 = vpop.f32.mrf.mxu0 }
  0x9f   :  { %v350_v31 = vadd.f32 %v1082_v28, %v349_v30  ;;  %v398_v32 = vpop.f32.mrf.mxu1 }
  0xa1   :  { %v399_v33 = vadd.f32 %v398_v32, %v350_v31 }
  0xa3   :  { %v448_v36 = vadd.f32 %v447_v26, %v399_v33 }
  0xa5   :  { %v454_v34 = vpop.f32.mrf.mxu2  ;;  %v503_v40 = vmul.f32 0.1, %v448_v36  ;;  %vm487_vm1 = vcmp.ge.f32.partialorder %v448_v36, 0.0  ;;  %v1091_v57 = vpop.f32.mrf.mxu3 }
  0xa6   :  { %v351_v35 = vpop.f32.mrf.mxu0 }
  0xa7   :  { %v352_v37 = vadd.f32 %v1082_v28, %v351_v35  ;;  %v400_v38 = vpop.f32.mrf.mxu1  ;;  %v519_v45 = vsel %vm487_vm1, %v448_v36, %v503_v40 }
  0xa9   :  { %v401_v39 = vadd.f32 %v400_v38, %v352_v37 }
  0xab   :  { %v450_v41 = vadd.f32 %v449_v27, %v401_v39 }
  0xad   :  { %vm488_vm2 = vcmp.ge.f32.partialorder %v450_v41, 0.0  ;;  %v504_v42 = vmul.f32 0.1, %v450_v41  ;;  %v457_v43 = vpop.f32.mrf.mxu2  ;;  %v1097_v5 = vpop.f32.mrf.mxu3 }
  0xae   :  { %v354_v44 = vpop.f32.mrf.mxu0 }
  0xaf   :  { %v520_v46 = vsel %vm488_vm2, %v450_v41, %v504_v42  ;;  %v355_v47 = vadd.f32 %v1082_v28, %v354_v44  ;;  %v403_v48 = vpop.f32.mrf.mxu1 }
  0xb0   :  { %v792_v49 = vpack.c.bf16 %v520_v46, %v519_v45 }
  0xb1   :  { %v404_v50 = vadd.f32 %v403_v48, %v355_v47 }
  0xb2   :  { %793 = vst [vmem:[%s1139_s3] sm:$0xff] %v792_v49  }
  0xb3   :  { %v453_v53 = vadd.f32 %v452_v29, %v404_v50 }
  0xb5   :  { %v459_v51 = vpop.f32.mrf.mxu2  ;;  %v505_v58 = vmul.f32 0.1, %v453_v53  ;;  %vm489_vm3 = vcmp.ge.f32.partialorder %v453_v53, 0.0  ;;  %v1100_v17 = vpop.f32.mrf.mxu3 }
  0xb6   :  { %v356_v52 = vpop.f32.mrf.mxu0 }
  0xb7   :  { %v357_v54 = vadd.f32 %v1082_v28, %v356_v52  ;;  %v405_v55 = vpop.f32.mrf.mxu1  ;;  %v521_v63 = vsel %vm489_vm3, %v453_v53, %v505_v58  ;;  %v380_v52 = vadd.f32 %v1082_v28, %v1091_v57 }
  0xb9   :  { %v406_v56 = vadd.f32 %v405_v55, %v357_v54 }
  0xbb   :  { %v455_v59 = vadd.f32 %v454_v34, %v406_v56 }
  0xbd   :  { %vm490_vm4 = vcmp.ge.f32.partialorder %v455_v59, 0.0  ;;  %v506_v60 = vmul.f32 0.1, %v455_v59  ;;  %v462_v61 = vpop.f32.mrf.mxu2  ;;  %v1107_v30 = vpop.f32.mrf.mxu3 }
  0xbe   :  { %v359_v62 = vpop.f32.mrf.mxu0 }
  0xbf   :  { %v522_v0 = vsel %vm490_vm4, %v455_v59, %v506_v60  ;;  %v360_v1 = vadd.f32 %v1082_v28, %v359_v62  ;;  %v408_v2 = vpop.f32.mrf.mxu1  ;;  %v382_v62 = vadd.f32 %v1082_v28, %v1097_v5 }
  0xc0   :  { %v797_v3 = vpack.c.bf16 %v522_v0, %v521_v63 }
  0xc1   :  { %v409_v4 = vadd.f32 %v408_v2, %v360_v1 }
  0xc2   :  { %829 = vst [vmem:[%s1139_s3 + $0x8] sm:$0xff] %v797_v3  }
  0xc3   :  { %v458_v8 = vadd.f32 %v457_v43, %v409_v4 }
  0xc5   :  { %v464_v6 = vpop.f32.mrf.mxu2  ;;  %v507_v12 = vmul.f32 0.1, %v458_v8  ;;  %vm491_vm5 = vcmp.ge.f32.partialorder %v458_v8, 0.0  ;;  %v428_v42 = vpop.f32.mrf.mxu3 }
  0xc6   :  { %v361_v7 = vpop.f32.mrf.mxu0  ;;  %v429_v63 = vadd.f32 %v428_v42, %v380_v52 }
  0xc7   :  { %v362_v9 = vadd.f32 %v1082_v28, %v361_v7  ;;  %v410_v10 = vpop.f32.mrf.mxu1  ;;  %v523_v18 = vsel %vm491_vm5, %v458_v8, %v507_v12 }
  0xc9   :  { %v411_v11 = vadd.f32 %v410_v10, %v362_v9 }
  0xcb   :  { %v460_v13 = vadd.f32 %v459_v51, %v411_v11 }
  0xcd   :  { %vm492_vm6 = vcmp.ge.f32.partialorder %v460_v13, 0.0  ;;  %v508_v14 = vmul.f32 0.1, %v460_v13  ;;  %v467_v15 = vpop.f32.mrf.mxu2  ;;  %v430_v53 = vpop.f32.mrf.mxu3 }
  0xce   :  { %v364_v16 = vpop.f32.mrf.mxu0  ;;  %v431_v2 = vadd.f32 %v430_v53, %v382_v62 }
  0xcf   :  { %v524_v19 = vsel %vm492_vm6, %v460_v13, %v508_v14  ;;  %v365_v20 = vadd.f32 %v1082_v28, %v364_v16  ;;  %v413_v21 = vpop.f32.mrf.mxu1 }
  0xd0   :  { %v802_v22 = vpack.c.bf16 %v524_v19, %v523_v18  ;;  %v385_v19 = vadd.f32 %v1082_v28, %v1100_v17 }
  0xd1   :  { %v414_v23 = vadd.f32 %v413_v21, %v365_v20 }
  0xd2   :  { %830 = vst [vmem:[%s1139_s3 + $0x10] sm:$0xff] %v802_v22  }
  0xd3   :  { %v463_v26 = vadd.f32 %v462_v61, %v414_v23 }
  0xd5   :  { %v469_v24 = vpop.f32.mrf.mxu2  ;;  %v509_v32 = vmul.f32 0.1, %v463_v26  ;;  %vm493_vm7 = vcmp.ge.f32.partialorder %v463_v26, 0.0  ;;  %v433_v8 = vpop.f32.mrf.mxu3 }
  0xd6   :  { %v366_v25 = vpop.f32.mrf.mxu0 }
  0xd7   :  { %v367_v27 = vadd.f32 %v1082_v28, %v366_v25  ;;  %v415_v29 = vpop.f32.mrf.mxu1  ;;  %v525_v37 = vsel %vm493_vm7, %v463_v26, %v509_v32  ;;  %v434_v25 = vadd.f32 %v433_v8, %v385_v19 }
  0xd9   :  { %v416_v31 = vadd.f32 %v415_v29, %v367_v27 }
  0xdb   :  { %v465_v33 = vadd.f32 %v464_v6, %v416_v31 }
  0xdd   :  { %vm494_vm8 = vcmp.ge.f32.partialorder %v465_v33, 0.0  ;;  %v510_v34 = vmul.f32 0.1, %v465_v33  ;;  %v472_v35 = vpop.f32.mrf.mxu2  ;;  %v435_v27 = vpop.f32.mrf.mxu3 }
  0xde   :  { %v369_v36 = vpop.f32.mrf.mxu0 }
  0xdf   :  { %v526_v38 = vsel %vm494_vm8, %v465_v33, %v510_v34  ;;  %v370_v39 = vadd.f32 %v1082_v28, %v369_v36  ;;  %v418_v40 = vpop.f32.mrf.mxu1 }
  0xe0   :  { %v807_v41 = vpack.c.bf16 %v526_v38, %v525_v37 }
  0xe1   :  { %v419_v43 = vadd.f32 %v418_v40, %v370_v39 }
  0xe2   :  { %831 = vst [vmem:[%s1139_s3 + $0x18] sm:$0xff] %v807_v41  }
  0xe3   :  { %v468_v46 = vadd.f32 %v467_v15, %v419_v43 }
  0xe5   :  { %v474_v44 = vpop.f32.mrf.mxu2  ;;  %v511_v50 = vmul.f32 0.1, %v468_v46  ;;  %vm495_vm9 = vcmp.ge.f32.partialorder %v468_v46, 0.0 }
  0xe6   :  { %v371_v45 = vpop.f32.mrf.mxu0 }
  0xe7   :  { %v372_v47 = vadd.f32 %v1082_v28, %v371_v45  ;;  %v420_v48 = vpop.f32.mrf.mxu1  ;;  %v527_v58 = vsel %vm495_vm9, %v468_v46, %v511_v50 }
  0xe9   :  { %v421_v49 = vadd.f32 %v420_v48, %v372_v47 }
  0xeb   :  { %v470_v51 = vadd.f32 %v469_v24, %v421_v49  ;;  %v387_v24 = vadd.f32 %v1082_v28, %v1107_v30 }
  0xed   :  { %vm496_vm10 = vcmp.ge.f32.partialorder %v470_v51, 0.0  ;;  %v512_v54 = vmul.f32 0.1, %v470_v51  ;;  %v477_v55 = vpop.f32.mrf.mxu2  ;;  %v436_v29 = vadd.f32 %v435_v27, %v387_v24 }
  0xee   :  { %v374_v56 = vpop.f32.mrf.mxu0  ;;  %v478_v57 = vadd.f32 %v477_v55, %v429_v63 }
  0xef   :  { %v528_v59 = vsel %vm496_vm10, %v470_v51, %v512_v54  ;;  %v375_v60 = vadd.f32 %v1082_v28, %v374_v56  ;;  %v423_v61 = vpop.f32.mrf.mxu1 }
  0xf0   :  { %v812_v0 = vpack.c.bf16 %v528_v59, %v527_v58  ;;  %v515_v4 = vmul.f32 0.1, %v478_v57  ;;  %vm499_vm11 = vcmp.ge.f32.partialorder %v478_v57, 0.0 }
  0xf1   :  { %v424_v1 = vadd.f32 %v423_v61, %v375_v60 }
  0xf2   :  { %832 = vst [vmem:[%s1139_s3 + $0x20] sm:$0xff] %v812_v0   ;;  %v531_v13 = vsel %vm499_vm11, %v478_v57, %v515_v4 }
  0xf3   :  { %v473_v9 = vadd.f32 %v472_v35, %v424_v1 }
  0xf5   :  { %v479_v3 = vpop.f32.mrf.mxu2  ;;  %v513_v15 = vmul.f32 0.1, %v473_v9  ;;  %vm497_vm13 = vcmp.ge.f32.partialorder %v473_v9, 0.0 }
  0xf6   :  { %v480_v6 = vadd.f32 %v479_v3, %v431_v2  ;;  %v376_v7 = vpop.f32.mrf.mxu0 }
  0xf7   :  { %v377_v10 = vadd.f32 %v1082_v28, %v376_v7  ;;  %v425_v11 = vpop.f32.mrf.mxu1  ;;  %v529_v22 = vsel %vm497_vm13, %v473_v9, %v513_v15 }
  0xf8   :  { %vm500_vm12 = vcmp.ge.f32.partialorder %v480_v6, 0.0  ;;  %v516_v5 = vmul.f32 0.1, %v480_v6 }
  0xf9   :  { %v426_v12 = vadd.f32 %v425_v11, %v377_v10 }
  0xfa   :  { %v532_v14 = vsel %vm500_vm12, %v480_v6, %v516_v5 }
  0xfb   :  { %v822_v16 = vpack.c.bf16 %v532_v14, %v531_v13  ;;  %v475_v18 = vadd.f32 %v474_v44, %v426_v12 }
  0xfd   :  { %834 = vst [vmem:[%s1139_s3 + $0x30] sm:$0xff] %v822_v16   ;;  %vm498_vm14 = vcmp.ge.f32.partialorder %v475_v18, 0.0  ;;  %v514_v20 = vmul.f32 0.1, %v475_v18  ;;  %v482_v21 = vpop.f32.mrf.mxu2 }
  0xfe   :  { %v483_v17 = vadd.f32 %v482_v21, %v434_v25 }
  0xff   :  { %v530_v23 = vsel %vm498_vm14, %v475_v18, %v514_v20 }
 0x100   :  { %v817_v26 = vpack.c.bf16 %v530_v23, %v529_v22  ;;  %v517_v32 = vmul.f32 0.1, %v483_v17  ;;  %vm501_vm15 = vcmp.ge.f32.partialorder %v483_v17, 0.0 }
 0x102   :  { %833 = vst [vmem:[%s1139_s3 + $0x28] sm:$0xff] %v817_v26   ;;  %v533_v35 = vsel %vm501_vm15, %v483_v17, %v517_v32 }
 0x105   :  { %v484_v31 = vpop.f32.mrf.mxu2 }
 0x106   :  { %v485_v33 = vadd.f32 %v484_v31, %v436_v29 }
 0x108   :  { %vm502_vm0 = vcmp.ge.f32.partialorder %v485_v33, 0.0  ;;  %v518_v34 = vmul.f32 0.1, %v485_v33 }
 0x10a   :  { %v534_v36 = vsel %vm502_vm0, %v485_v33, %v518_v34 }
 0x10b   :  { %v827_v37 = vpack.c.bf16 %v534_v36, %v533_v35 }
 0x10d   :  { %835 = vst [vmem:[%s1139_s3 + $0x38] sm:$0xff] %v827_v37  }

// kernel: _lambda_.9
= control target key start
LH: loop header
LB: loop body
LE: loop exit
PB: predicated region body
PF: predicated region fallthrough
CT: control target
= control target key end

     0   :  { %s807_s1 = inlined_call_operand.vmem [shape: bf16[512,128], index: 1, kind: input, shape index: {}]   ;;  %s808_s2 = inlined_call_operand.vmem [shape: f32[1,128], index: 2, kind: input, shape index: {}]   ;;  %s809_s0 = inlined_call_operand.vmem [shape: bf16[32,512], index: 0, kind: input, shape index: {}]   ;;  %s810_s3 = inlined_call_operand.vmem [shape: bf16[32,128], index: 3, kind: output, shape index: {}]  }
   0x1   :  { %v597_v0 = vld [vmem:[%s807_s1 + $0x38] sm:$0xff]  ;;  %v596_v4 = vld [vmem:[%s807_s1 + $0x30] sm:$0xff]  ;;  %v595_v8 = vld [vmem:[%s807_s1 + $0x28] sm:$0xff] }
   0x2   :  { %v605_v1 = vld [vmem:[%s807_s1 + $0x78] sm:$0xff]  ;;  %322 = vmatpush.bf16.msra.mxu0 %v597_v0  ;;  %v604_v5 = vld [vmem:[%s807_s1 + $0x70] sm:$0xff]  ;;  %v603_v9 = vld [vmem:[%s807_s1 + $0x68] sm:$0xff] }
   0x3   :  { %v613_v2 = vld [vmem:[%s807_s1 + $0xb8] sm:$0xff]  ;;  %341 = vmatpush.bf16.msra.mxu1 %v605_v1  ;;  %v612_v6 = vld [vmem:[%s807_s1 + $0xb0] sm:$0xff]  ;;  %v611_v10 = vld [vmem:[%s807_s1 + $0xa8] sm:$0xff] }
   0x4   :  { %v621_v3 = vld [vmem:[%s807_s1 + $0xf8] sm:$0xff]  ;;  %360 = vmatpush.bf16.msra.mxu2 %v613_v2  ;;  %v620_v7 = vld [vmem:[%s807_s1 + $0xf0] sm:$0xff]  ;;  %v619_v11 = vld [vmem:[%s807_s1 + $0xe8] sm:$0xff] }
   0x5   :  { %379 = vmatpush.bf16.msra.mxu3 %v621_v3  ;;  %v594_v12 = vld [vmem:[%s807_s1 + $0x20] sm:$0xff]  ;;  %v593_v16 = vld [vmem:[%s807_s1 + $0x18] sm:$0xff]  ;;  %v592_v20 = vld [vmem:[%s807_s1 + $0x10] sm:$0xff] }
   0x6   :  { %323 = vmatpush.bf16.msra.mxu0 %v596_v4  ;;  %v602_v13 = vld [vmem:[%s807_s1 + $0x60] sm:$0xff]  ;;  %v601_v17 = vld [vmem:[%s807_s1 + $0x58] sm:$0xff]  ;;  %v600_v21 = vld [vmem:[%s807_s1 + $0x50] sm:$0xff] }
   0x7   :  { %342 = vmatpush.bf16.msra.mxu1 %v604_v5  ;;  %v610_v14 = vld [vmem:[%s807_s1 + $0xa0] sm:$0xff]  ;;  %v609_v18 = vld [vmem:[%s807_s1 + $0x98] sm:$0xff]  ;;  %v608_v22 = vld [vmem:[%s807_s1 + $0x90] sm:$0xff] }
   0x8   :  { %361 = vmatpush.bf16.msra.mxu2 %v612_v6  ;;  %v618_v15 = vld [vmem:[%s807_s1 + $0xe0] sm:$0xff]  ;;  %v617_v19 = vld [vmem:[%s807_s1 + $0xd8] sm:$0xff]  ;;  %v616_v23 = vld [vmem:[%s807_s1 + $0xd0] sm:$0xff] }
   0x9   :  { %380 = vmatpush.bf16.msra.mxu3 %v620_v7  ;;  %v591_v24 = vld [vmem:[%s807_s1 + $0x8] sm:$0xff]  ;;  %v590_v28 = vld [vmem:[%s807_s1] sm:$0xff]  ;;  %v584_v33 = vld [vmem:[%s809_s0 + $0xc] sm:$0xf0] }
   0xa   :  { %324 = vmatpush.bf16.msra.mxu0 %v595_v8  ;;  %v599_v25 = vld [vmem:[%s807_s1 + $0x48] sm:$0xff]  ;;  %v598_v29 = vld [vmem:[%s807_s1 + $0x40] sm:$0xff]  ;;  %v426_v35 = vld [vmem:[%s809_s0 + $0x10] sm:$0xf0] }
   0xb   :  { %343 = vmatpush.bf16.msra.mxu1 %v603_v9  ;;  %v607_v26 = vld [vmem:[%s807_s1 + $0x88] sm:$0xff]  ;;  %v606_v30 = vld [vmem:[%s807_s1 + $0x80] sm:$0xff]  ;;  %v585_v37 = vld [vmem:[%s809_s0 + $0x14] sm:$0xf0] }
   0xc   :  { %362 = vmatpush.bf16.msra.mxu2 %v611_v10  ;;  %v615_v27 = vld [vmem:[%s807_s1 + $0xc8] sm:$0xff]  ;;  %v614_v31 = vld [vmem:[%s807_s1 + $0xc0] sm:$0xff]  ;;  %v434_v39 = vld [vmem:[%s809_s0 + $0x18] sm:$0xf0] }
   0xd   :  { %381 = vmatpush.bf16.msra.mxu3 %v619_v11  ;;  %v424_v32 = vld [vmem:[%s809_s0] sm:$0xf]  ;;  %v582_v34 = vld [vmem:[%s809_s0 + $0x4] sm:$0xf]  ;;  %v432_v36 = vld [vmem:[%s809_s0 + $0x8] sm:$0xf] }
   0xe   :  { %325 = vmatpush.bf16.msra.mxu0 %v594_v12  ;;  %v583_v38 = vld [vmem:[%s809_s0 + $0xc] sm:$0xf]  ;;  %v425_v40 = vor.u32 %v584_v33, %v424_v32  ;;  %v429_v41 = vor.u32 %v582_v34, %v426_v35  ;;  %v433_v42 = vor.u32 %v585_v37, %v432_v36  ;;  %v440_v44 = vld [vmem:[%s809_s0 + $0x20] sm:$0xf]  ;;  %v588_v45 = vld [vmem:[%s809_s0 + $0x2c] sm:$0xf0] }
   0xf   :  { %344 = vmatpush.bf16.msra.mxu1 %v602_v13  ;;  %v437_v43 = vor.u32 %v583_v38, %v434_v39  ;;  %v586_v46 = vld [vmem:[%s809_s0 + $0x24] sm:$0xf]  ;;  %v442_v47 = vld [vmem:[%s809_s0 + $0x30] sm:$0xf0]  ;;  %v448_v48 = vld [vmem:[%s809_s0 + $0x28] sm:$0xf]  ;;  %v441_v52 = vor.u32 %v588_v45, %v440_v44 }
  0x10   :  { %363 = vmatpush.bf16.msra.mxu2 %v610_v14  ;;  %v589_v49 = vld [vmem:[%s809_s0 + $0x34] sm:$0xf0]  ;;  %v587_v50 = vld [vmem:[%s809_s0 + $0x2c] sm:$0xf]  ;;  %v450_v51 = vld [vmem:[%s809_s0 + $0x38] sm:$0xf0]  ;;  %v445_v53 = vor.u32 %v586_v46, %v442_v47 }
  0x11   :  { %382 = vmatpush.bf16.msra.mxu3 %v618_v15  ;;  %v449_v54 = vor.u32 %v589_v49, %v448_v48  ;;  %v453_v55 = vor.u32 %v587_v50, %v450_v51  ;;  %v633_v56 = vld [vmem:[%s808_s2] ss:$0 sm:$0xff] }
  0x12   :  { %326 = vmatpush.bf16.msra.mxu0 %v593_v16 }
  0x13   :  { %345 = vmatpush.bf16.msra.mxu1 %v601_v17 }
  0x14   :  { %364 = vmatpush.bf16.msra.mxu2 %v609_v18 }
  0x15   :  { %383 = vmatpush.bf16.msra.mxu3 %v617_v19 }
  0x16   :  { %327 = vmatpush.bf16.msra.mxu0 %v592_v20 }
  0x17   :  { %346 = vmatpush.bf16.msra.mxu1 %v600_v21 }
  0x18   :  { %365 = vmatpush.bf16.msra.mxu2 %v608_v22 }
  0x19   :  { %384 = vmatpush.bf16.msra.mxu3 %v616_v23 }
  0x1a   :  { %328 = vmatpush.bf16.msra.mxu0 %v591_v24 }
  0x1b   :  { %347 = vmatpush.bf16.msra.mxu1 %v599_v25 }
  0x1c   :  { %366 = vmatpush.bf16.msra.mxu2 %v607_v26 }
  0x1d   :  { %385 = vmatpush.bf16.msra.mxu3 %v615_v27 }
  0x1e   :  { %329 = vmatpush.bf16.msra.mxu0 %v590_v28 }
  0x1f   :  { %348 = vmatpush.bf16.msra.mxu1 %v598_v29 }
  0x20   :  { %367 = vmatpush.bf16.msra.mxu2 %v606_v30 }
  0x21   :  { %386 = vmatpush.bf16.msra.mxu3 %v614_v31  ;;  %330 = vmatmul.bf16.vlgmr.msra.gmra.mxu0 %v425_v40 }
  0x22   :  { %349 = vmatmul.bf16.vlgmr.msra.gmra.mxu1 %v429_v41 }
  0x23   :  { %368 = vmatmul.bf16.vlgmr.msra.gmra.mxu2 %v433_v42 }
  0x24   :  { %387 = vmatmul.bf16.vlgmr.msra.gmra.mxu3 %v437_v43 }
  0x31   :  { %335 = vmatmul.bf16.gmra.mxu0 %v441_v52 }
  0x32   :  { %354 = vmatmul.bf16.gmra.mxu1 %v445_v53 }
  0x33   :  { %373 = vmatmul.bf16.gmra.mxu2 %v449_v54 }
  0x34   :  { %392 = vmatmul.bf16.gmra.mxu3 %v453_v55 }
  0x9e   :  { %v331_v57 = vpop.f32.mrf.mxu0 }
  0x9f   :  { %v350_v58 = vpop.f32.mrf.mxu1  ;;  %v332_v59 = vadd.f32 %v633_v56, %v331_v57 }
  0xa1   :  { %v351_v60 = vadd.f32 %v350_v58, %v332_v59 }
  0xa6   :  { %v369_v61 = vpop.f32.mrf.mxu2  ;;  %v333_v63 = vpop.f32.mrf.mxu0 }
  0xa7   :  { %v388_v62 = vpop.f32.mrf.mxu3  ;;  %v352_v0 = vpop.f32.mrf.mxu1  ;;  %v370_v1 = vadd.f32 %v369_v61, %v351_v60  ;;  %v334_v2 = vadd.f32 %v633_v56, %v333_v63 }
  0xa9   :  { %v389_v3 = vadd.f32 %v388_v62, %v370_v1  ;;  %v353_v4 = vadd.f32 %v352_v0, %v334_v2 }
  0xab   :  { %v402_v9 = vmul.f32 0.1, %v389_v3  ;;  %vm398_vm0 = vcmp.ge.f32.partialorder %v389_v3, 0.0 }
  0xad   :  { %v406_v14 = vsel %vm398_vm0, %v389_v3, %v402_v9 }
  0xae   :  { %v371_v5 = vpop.f32.mrf.mxu2  ;;  %v336_v8 = vpop.f32.mrf.mxu0 }
  0xaf   :  { %v390_v6 = vpop.f32.mrf.mxu3  ;;  %v372_v7 = vadd.f32 %v371_v5, %v353_v4  ;;  %v337_v11 = vadd.f32 %v633_v56, %v336_v8  ;;  %v355_v12 = vpop.f32.mrf.mxu1 }
  0xb1   :  { %v391_v10 = vadd.f32 %v390_v6, %v372_v7  ;;  %v356_v16 = vadd.f32 %v355_v12, %v337_v11 }
  0xb3   :  { %vm399_vm1 = vcmp.ge.f32.partialorder %v391_v10, 0.0  ;;  %v403_v13 = vmul.f32 0.1, %v391_v10 }
  0xb5   :  { %v407_v15 = vsel %vm399_vm1, %v391_v10, %v403_v13 }
  0xb6   :  { %v625_v17 = vpack.c.bf16 %v407_v15, %v406_v14  ;;  %v374_v18 = vpop.f32.mrf.mxu2  ;;  %v338_v20 = vpop.f32.mrf.mxu0 }
  0xb7   :  { %v393_v19 = vpop.f32.mrf.mxu3  ;;  %v375_v21 = vadd.f32 %v374_v18, %v356_v16  ;;  %v339_v22 = vadd.f32 %v633_v56, %v338_v20  ;;  %v357_v23 = vpop.f32.mrf.mxu1 }
  0xb8   :  { %626 = vst [vmem:[%s810_s3] sm:$0xff] %v625_v17  }
  0xb9   :  { %v394_v24 = vadd.f32 %v393_v19, %v375_v21  ;;  %v358_v25 = vadd.f32 %v357_v23, %v339_v22 }
  0xbb   :  { %v404_v29 = vmul.f32 0.1, %v394_v24  ;;  %vm400_vm2 = vcmp.ge.f32.partialorder %v394_v24, 0.0 }
  0xbd   :  { %v408_v32 = vsel %vm400_vm2, %v394_v24, %v404_v29 }
  0xbe   :  { %v376_v26 = vpop.f32.mrf.mxu2 }
  0xbf   :  { %v377_v27 = vadd.f32 %v376_v26, %v358_v25  ;;  %v395_v28 = vpop.f32.mrf.mxu3 }
  0xc1   :  { %v396_v30 = vadd.f32 %v395_v28, %v377_v27 }
  0xc3   :  { %vm401_vm3 = vcmp.ge.f32.partialorder %v396_v30, 0.0  ;;  %v405_v31 = vmul.f32 0.1, %v396_v30 }
  0xc5   :  { %v409_v33 = vsel %vm401_vm3, %v396_v30, %v405_v31 }
  0xc6   :  { %v630_v34 = vpack.c.bf16 %v409_v33, %v408_v32 }
  0xc8   :  { %632 = vst [vmem:[%s810_s3 + $0x8] sm:$0xff] %v630_v34  }

// kernel: _lambda_.10
= control target key start
LH: loop header
LB: loop body
LE: loop exit
PB: predicated region body
PF: predicated region fallthrough
CT: control target
= control target key end

     0   :  { %vm369_vm0 = vcmask 523264   ;;  %s940_s1 = inlined_call_operand.vmem [shape: bf16[576,128], index: 1, kind: input, shape index: {}]   ;;  %s941_s2 = inlined_call_operand.vmem [shape: f32[1,128], index: 2, kind: input, shape index: {}]   ;;  %s942_s0 = inlined_call_operand.vmem [shape: bf16[32,576], index: 0, kind: input, shape index: {}]   ;;  %s943_s3 = inlined_call_operand.vmem [shape: bf16[32,128], index: 3, kind: output, shape index: {}]  }
   0x1   :  { %v698_v0 = vld [vmem:[%s940_s1 + $0x38] sm:$0xff]  ;;  %v697_v4 = vld [vmem:[%s940_s1 + $0x30] sm:$0xff]  ;;  %v696_v8 = vld [vmem:[%s940_s1 + $0x28] sm:$0xff] }
   0x2   :  { %v706_v1 = vld [vmem:[%s940_s1 + $0x78] sm:$0xff]  ;;  %376 = vmatpush.bf16.msra.mxu0 %v698_v0  ;;  %v705_v5 = vld [vmem:[%s940_s1 + $0x70] sm:$0xff]  ;;  %v704_v9 = vld [vmem:[%s940_s1 + $0x68] sm:$0xff] }
   0x3   :  { %v714_v2 = vld [vmem:[%s940_s1 + $0xb8] sm:$0xff]  ;;  %395 = vmatpush.bf16.msra.mxu1 %v706_v1  ;;  %v713_v6 = vld [vmem:[%s940_s1 + $0xb0] sm:$0xff]  ;;  %v712_v10 = vld [vmem:[%s940_s1 + $0xa8] sm:$0xff] }
   0x4   :  { %v722_v3 = vld [vmem:[%s940_s1 + $0xf8] sm:$0xff]  ;;  %414 = vmatpush.bf16.msra.mxu2 %v714_v2  ;;  %v721_v7 = vld [vmem:[%s940_s1 + $0xf0] sm:$0xff]  ;;  %v720_v11 = vld [vmem:[%s940_s1 + $0xe8] sm:$0xff] }
   0x5   :  { %433 = vmatpush.bf16.msra.mxu3 %v722_v3  ;;  %v695_v12 = vld [vmem:[%s940_s1 + $0x20] sm:$0xff]  ;;  %v694_v16 = vld [vmem:[%s940_s1 + $0x18] sm:$0xff]  ;;  %v693_v20 = vld [vmem:[%s940_s1 + $0x10] sm:$0xff] }
   0x6   :  { %377 = vmatpush.bf16.msra.mxu0 %v697_v4  ;;  %v703_v13 = vld [vmem:[%s940_s1 + $0x60] sm:$0xff]  ;;  %v702_v17 = vld [vmem:[%s940_s1 + $0x58] sm:$0xff]  ;;  %v701_v21 = vld [vmem:[%s940_s1 + $0x50] sm:$0xff] }
   0x7   :  { %396 = vmatpush.bf16.msra.mxu1 %v705_v5  ;;  %v711_v14 = vld [vmem:[%s940_s1 + $0xa0] sm:$0xff]  ;;  %v710_v18 = vld [vmem:[%s940_s1 + $0x98] sm:$0xff]  ;;  %v709_v22 = vld [vmem:[%s940_s1 + $0x90] sm:$0xff] }
   0x8   :  { %415 = vmatpush.bf16.msra.mxu2 %v713_v6  ;;  %v719_v15 = vld [vmem:[%s940_s1 + $0xe0] sm:$0xff]  ;;  %v718_v19 = vld [vmem:[%s940_s1 + $0xd8] sm:$0xff]  ;;  %v717_v23 = vld [vmem:[%s940_s1 + $0xd0] sm:$0xff] }
   0x9   :  { %434 = vmatpush.bf16.msra.mxu3 %v721_v7  ;;  %v692_v24 = vld [vmem:[%s940_s1 + $0x8] sm:$0xff]  ;;  %v691_v28 = vld [vmem:[%s940_s1] sm:$0xff]  ;;  %v683_v33 = vld [vmem:[%s942_s0 + $0x10] sm:$0xf0] }
   0xa   :  { %378 = vmatpush.bf16.msra.mxu0 %v696_v8  ;;  %v700_v25 = vld [vmem:[%s940_s1 + $0x48] sm:$0xff]  ;;  %v699_v29 = vld [vmem:[%s940_s1 + $0x40] sm:$0xff]  ;;  %v499_v35 = vld [vmem:[%s942_s0 + $0x14] sm:$0xf0] }
   0xb   :  { %397 = vmatpush.bf16.msra.mxu1 %v704_v9  ;;  %v708_v26 = vld [vmem:[%s940_s1 + $0x88] sm:$0xff]  ;;  %v707_v30 = vld [vmem:[%s940_s1 + $0x80] sm:$0xff]  ;;  %v684_v37 = vld [vmem:[%s942_s0 + $0x18] sm:$0xf0] }
   0xc   :  { %416 = vmatpush.bf16.msra.mxu2 %v712_v10  ;;  %v716_v27 = vld [vmem:[%s940_s1 + $0xc8] sm:$0xff]  ;;  %v715_v31 = vld [vmem:[%s940_s1 + $0xc0] sm:$0xff]  ;;  %v726_v40 = vld [vmem:[%s940_s1 + $0x118] sm:$0xff] }
   0xd   :  { %435 = vmatpush.bf16.msra.mxu3 %v720_v11  ;;  %v497_v32 = vld [vmem:[%s942_s0] sm:$0xf]  ;;  %v681_v34 = vld [vmem:[%s942_s0 + $0x4] sm:$0xf]  ;;  %v505_v36 = vld [vmem:[%s942_s0 + $0x8] sm:$0xf] }
   0xe   :  { %379 = vmatpush.bf16.msra.mxu0 %v695_v12  ;;  %v682_v38 = vld [vmem:[%s942_s0 + $0xc] sm:$0xf]  ;;  %v507_v39 = vld [vmem:[%s942_s0 + $0x1c] sm:$0xf0]  ;;  %v498_v41 = vor.u32 %v683_v33, %v497_v32  ;;  %v502_v42 = vor.u32 %v681_v34, %v499_v35  ;;  %v506_v43 = vor.u32 %v684_v37, %v505_v36  ;;  %v725_v45 = vld [vmem:[%s940_s1 + $0x110] sm:$0xff] }
   0xf   :  { %398 = vmatpush.bf16.msra.mxu1 %v703_v13  ;;  %v510_v44 = vor.u32 %v682_v38, %v507_v39  ;;  %v724_v46 = vld [vmem:[%s940_s1 + $0x108] sm:$0xff]  ;;  %v723_v47 = vld [vmem:[%s940_s1 + $0x100] sm:$0xff]  ;;  %v688_v49 = vld [vmem:[%s942_s0 + $0x38] sm:$0xf0] }
  0x10   :  { %417 = vmatpush.bf16.msra.mxu2 %v711_v14  ;;  %v517_v48 = vld [vmem:[%s942_s0 + $0x28] sm:$0xf]  ;;  %v686_v50 = vld [vmem:[%s942_s0 + $0x2c] sm:$0xf]  ;;  %v519_v51 = vld [vmem:[%s942_s0 + $0x3c] sm:$0xf0] }
  0x11   :  { %436 = vmatpush.bf16.msra.mxu3 %v719_v15  ;;  %v525_v52 = vld [vmem:[%s942_s0 + $0x30] sm:$0xf]  ;;  %v689_v53 = vld [vmem:[%s942_s0 + $0x40] sm:$0xf0]  ;;  %v687_v54 = vld [vmem:[%s942_s0 + $0x34] sm:$0xf]  ;;  %v518_v56 = vor.u32 %v688_v49, %v517_v48  ;;  %v522_v57 = vor.u32 %v686_v50, %v519_v51 }
  0x12   :  { %380 = vmatpush.bf16.msra.mxu0 %v694_v16  ;;  %v527_v55 = vld [vmem:[%s942_s0 + $0x44] sm:$0xf0]  ;;  %v526_v58 = vor.u32 %v689_v53, %v525_v52  ;;  %v513_v60 = vld [vmem:[%s942_s0 + $0x10] sm:$0xf]  ;;  %v685_v61 = vld [vmem:[%s942_s0 + $0x20] sm:$0xf0] }
  0x13   :  { %399 = vmatpush.bf16.msra.mxu1 %v702_v17  ;;  %v530_v59 = vor.u32 %v687_v54, %v527_v55  ;;  %v533_v62 = vld [vmem:[%s942_s0 + $0x38] sm:$0xf]  ;;  %v690_v63 = vld [vmem:[%s942_s0 + $0x48] sm:$0xf0]  ;;  %v514_v0 = vor.u32 %v685_v61, %v513_v60  ;;  %v742_v12 = vld [vmem:[%s941_s2] ss:$0 sm:$0xff] }
  0x14   :  { %418 = vmatpush.bf16.msra.mxu2 %v710_v18  ;;  %v534_v1 = vor.u32 %v690_v63, %v533_v62 }
  0x15   :  { %437 = vmatpush.bf16.msra.mxu3 %v718_v19 }
  0x16   :  { %381 = vmatpush.bf16.msra.mxu0 %v693_v20 }
  0x17   :  { %400 = vmatpush.bf16.msra.mxu1 %v701_v21 }
  0x18   :  { %419 = vmatpush.bf16.msra.mxu2 %v709_v22 }
  0x19   :  { %438 = vmatpush.bf16.msra.mxu3 %v717_v23 }
  0x1a   :  { %382 = vmatpush.bf16.msra.mxu0 %v692_v24 }
  0x1b   :  { %401 = vmatpush.bf16.msra.mxu1 %v700_v25 }
  0x1c   :  { %420 = vmatpush.bf16.msra.mxu2 %v708_v26 }
  0x1d   :  { %439 = vmatpush.bf16.msra.mxu3 %v716_v27 }
  0x1e   :  { %383 = vmatpush.bf16.msra.mxu0 %v691_v28 }
  0x1f   :  { %402 = vmatpush.bf16.msra.mxu1 %v699_v29 }
  0x20   :  { %421 = vmatpush.bf16.msra.mxu2 %v707_v30 }
  0x21   :  { %440 = vmatpush.bf16.msra.mxu3 %v715_v31  ;;  %384 = vmatmul.bf16.vlgmr.msra.gmra.mxu0 %v498_v41 }
  0x22   :  { %456 = vmatpush.bf16.msrb.mxu0 %v726_v40  ;;  %403 = vmatmul.bf16.vlgmr.msra.gmra.mxu1 %v502_v42 }
  0x23   :  { %738 = vmatpush.bf16.msrb.mxu1 %v726_v40  ;;  %422 = vmatmul.bf16.vlgmr.msra.gmra.mxu2 %v506_v43 }
  0x24   :  { %441 = vmatmul.bf16.vlgmr.msra.gmra.mxu3 %v510_v44 }
  0x26   :  { %457 = vmatpush.bf16.msrb.mxu0 %v725_v45 }
  0x27   :  { %739 = vmatpush.bf16.msrb.mxu1 %v725_v45 }
  0x2a   :  { %458 = vmatpush.bf16.msrb.mxu0 %v724_v46 }
  0x2b   :  { %740 = vmatpush.bf16.msrb.mxu1 %v724_v46 }
  0x2e   :  { %459 = vmatpush.bf16.msrb.mxu0 %v723_v47 }
  0x2f   :  { %741 = vmatpush.bf16.msrb.mxu1 %v723_v47 }
  0x31   :  { %389 = vmatmul.bf16.gmra.mxu0 %v518_v56 }
  0x32   :  { %408 = vmatmul.bf16.gmra.mxu1 %v522_v57 }
  0x33   :  { %427 = vmatmul.bf16.gmra.mxu2 %v526_v58 }
  0x34   :  { %446 = vmatmul.bf16.gmra.mxu3 %v530_v59 }
  0x41   :  { %679 = vmatmul.msk.bf16.vlgmr.msrb.gmra.mxu0 %vm369_vm0, %v514_v0 }
  0x42   :  { %680 = vmatmul.msk.bf16.vlgmr.msrb.gmra.mxu1 %vm369_vm0, %v534_v1 }
  0x9e   :  { %v385_v2 = vpop.f32.mrf.mxu0 }
  0x9f   :  { %v404_v3 = vpop.f32.mrf.mxu1  ;;  %v386_v16 = vadd.f32 %v742_v12, %v385_v2 }
  0xa1   :  { %v405_v19 = vadd.f32 %v404_v3, %v386_v16 }
  0xa6   :  { %v423_v4 = vpop.f32.mrf.mxu2  ;;  %v387_v6 = vpop.f32.mrf.mxu0 }
  0xa7   :  { %v442_v5 = vpop.f32.mrf.mxu3  ;;  %v406_v7 = vpop.f32.mrf.mxu1  ;;  %v388_v20 = vadd.f32 %v742_v12, %v387_v6  ;;  %v424_v23 = vadd.f32 %v423_v4, %v405_v19 }
  0xa9   :  { %v407_v28 = vadd.f32 %v406_v7, %v388_v20  ;;  %v443_v30 = vadd.f32 %v442_v5, %v424_v23 }
  0xae   :  { %v425_v8 = vpop.f32.mrf.mxu2  ;;  %v390_v9 = vpop.f32.mrf.mxu0 }
  0xaf   :  { %v409_v10 = vpop.f32.mrf.mxu1  ;;  %v444_v11 = vpop.f32.mrf.mxu3  ;;  %v391_v17 = vadd.f32 %v742_v12, %v390_v9  ;;  %v426_v31 = vadd.f32 %v425_v8, %v407_v28 }
  0xb1   :  { %v410_v21 = vadd.f32 %v409_v10, %v391_v17  ;;  %v445_v37 = vadd.f32 %v444_v11, %v426_v31 }
  0xb6   :  { %v428_v13 = vpop.f32.mrf.mxu2  ;;  %v392_v14 = vpop.f32.mrf.mxu0 }
  0xb7   :  { %v411_v15 = vpop.f32.mrf.mxu1  ;;  %v447_v18 = vpop.f32.mrf.mxu3  ;;  %v393_v22 = vadd.f32 %v742_v12, %v392_v14  ;;  %v429_v24 = vadd.f32 %v428_v13, %v410_v21 }
  0xb9   :  { %v412_v29 = vadd.f32 %v411_v15, %v393_v22  ;;  %v448_v32 = vadd.f32 %v447_v18, %v429_v24 }
  0xbe   :  { %v430_v25 = vpop.f32.mrf.mxu2  ;;  %v461_v26 = vpop.f32.mrf.mxu0 }
  0xbf   :  { %v466_v27 = vpop.f32.mrf.mxu1  ;;  %v431_v33 = vadd.f32 %v430_v25, %v412_v29  ;;  %v462_v34 = vadd.f32 %v461_v26, %v443_v30  ;;  %v449_v36 = vpop.f32.mrf.mxu3 }
  0xc0   :  { %v467_v35 = vadd.f32 %v466_v27, %v448_v32 }
  0xc1   :  { %v450_v38 = vadd.f32 %v449_v36, %v431_v33  ;;  %v475_v41 = vmul.f32 0.1, %v462_v34  ;;  %vm471_vm1 = vcmp.ge.f32.partialorder %v462_v34, 0.0 }
  0xc2   :  { %v477_v42 = vmul.f32 0.1, %v467_v35  ;;  %vm473_vm2 = vcmp.ge.f32.partialorder %v467_v35, 0.0 }
  0xc3   :  { %v479_v47 = vsel %vm471_vm1, %v462_v34, %v475_v41 }
  0xc4   :  { %v481_v48 = vsel %vm473_vm2, %v467_v35, %v477_v42 }
  0xc6   :  { %v463_v39 = vpop.f32.mrf.mxu0 }
  0xc7   :  { %v468_v40 = vpop.f32.mrf.mxu1  ;;  %v464_v43 = vadd.f32 %v463_v39, %v445_v37 }
  0xc8   :  { %v469_v44 = vadd.f32 %v468_v40, %v450_v38 }
  0xc9   :  { %vm472_vm3 = vcmp.ge.f32.partialorder %v464_v43, 0.0  ;;  %v476_v45 = vmul.f32 0.1, %v464_v43 }
  0xca   :  { %vm474_vm4 = vcmp.ge.f32.partialorder %v469_v44, 0.0  ;;  %v478_v46 = vmul.f32 0.1, %v469_v44 }
  0xcb   :  { %v480_v49 = vsel %vm472_vm3, %v464_v43, %v476_v45 }
  0xcc   :  { %v482_v50 = vsel %vm474_vm4, %v469_v44, %v478_v46  ;;  %v730_v51 = vpack.c.bf16 %v480_v49, %v479_v47 }
  0xcd   :  { %v735_v52 = vpack.c.bf16 %v482_v50, %v481_v48 }
  0xce   :  { %731 = vst [vmem:[%s943_s3] sm:$0xff] %v730_v51  }
  0xcf   :  { %737 = vst [vmem:[%s943_s3 + $0x8] sm:$0xff] %v735_v52  }

// kernel: _lambda_.11
= control target key start
LH: loop header
LB: loop body
LE: loop exit
PB: predicated region body
PF: predicated region fallthrough
CT: control target
= control target key end

     0   :  { %vm88_vm3 = vcmask 7168   ;;  %s131_s0 = inlined_call_operand.vmem [shape: bf16[8,1024], index: 0, kind: input, shape index: {}]   ;;  %s132_s1 = inlined_call_operand.vmem [shape: bf16[1,1024], index: 1, kind: input, shape index: {}]   ;;  %s133_s2 = inlined_call_operand.vmem [shape: f32[8,1], index: 2, kind: output, shape index: {}]  }
   0x1   :  { %v11_v0 = vld [vmem:[%s131_s0] sm:$0xff]  ;;  %v12_v1 = vld [vmem:[%s131_s0 + $0x8] sm:$0xff]  ;;  %v13_v8 = vld [vmem:[%s131_s0 + $0x10] sm:$0xff] }
   0x2   :  { %v23_v2 = vld [vmem:[%s132_s1] sm:$0xff]  ;;  %v15_v5 = vunpack.c.l.bf16 %v11_v0  ;;  %v16_v6 = vunpack.c.h.bf16 %v11_v0  ;;  %v17_v7 = vunpack.c.l.bf16 %v12_v1  ;;  %v18_v13 = vunpack.c.h.bf16 %v12_v1  ;;  %v14_v26 = vld [vmem:[%s131_s0 + $0x18] sm:$0xff] }
   0x3   :  { %v24_v3 = vunpack.c.l.bf16 %v23_v2  ;;  %v25_v4 = vunpack.c.h.bf16 %v23_v2  ;;  %v19_v20 = vunpack.c.l.bf16 %v13_v8  ;;  %v20_v27 = vunpack.c.h.bf16 %v13_v8 }
   0x4   :  { %v21_v32 = vunpack.c.l.bf16 %v14_v26  ;;  %v22_v36 = vunpack.c.h.bf16 %v14_v26 }
   0x5   :  { %v28_v9 = vperm.slane %v24_v3, 0  ;;  %v29_v10 = vperm.slane %v24_v3, 2  ;;  %v30_v11 = vperm.slane %v24_v3, 4  ;;  %v31_v12 = vperm.slane %v24_v3, 6 }
   0x6   :  { %v32_v14 = vperm.slane %v25_v4, 0  ;;  %v33_v15 = vperm.slane %v25_v4, 2  ;;  %v34_v21 = vperm.slane %v25_v4, 4  ;;  %v35_v28 = vperm.slane %v25_v4, 6 }
   0x7   :  { %v44_v16 = vperm.slane %v28_v9, 0  ;;  %v45_v17 = vperm.slane %v29_v10, 0  ;;  %v46_v18 = vperm.slane %v30_v11, 0  ;;  %v47_v19 = vperm.slane %v31_v12, 0 }
   0x8   :  { %v48_v22 = vperm.slane %v32_v14, 0  ;;  %v49_v29 = vperm.slane %v33_v15, 0  ;;  %v50_v33 = vperm.slane %v34_v21, 0  ;;  %v51_v37 = vperm.slane %v35_v28, 0 }
   0x9   :  { %v52_v23 = vmul.f32 %v44_v16, %v15_v5  ;;  %v53_v24 = vmul.f32 %v45_v17, %v16_v6  ;;  %v54_v25 = vmul.f32 %v46_v18, %v17_v7  ;;  %v55_v30 = vmul.f32 %v47_v19, %v18_v13 }
   0xa   :  { %v56_v34 = vmul.f32 %v48_v22, %v19_v20  ;;  %v57_v38 = vmul.f32 %v49_v29, %v20_v27  ;;  %v58_v40 = vmul.f32 %v50_v33, %v21_v32  ;;  %v59_v42 = vmul.f32 %v51_v37, %v22_v36 }
   0xb   :  { %v60_v31 = vadd.f32 %v53_v24, %v52_v23 }
   0xd   :  { %v61_v35 = vadd.f32 %v60_v31, %v54_v25 }
   0xf   :  { %v62_v39 = vadd.f32 %v61_v35, %v55_v30 }
  0x11   :  { %v63_v41 = vadd.f32 %v62_v39, %v56_v34 }
  0x13   :  { %v64_v43 = vadd.f32 %v63_v41, %v57_v38 }
  0x15   :  { %v65_v44 = vadd.f32 %v64_v43, %v58_v40 }
  0x17   :  { %v66_v45 = vadd.f32 %v65_v44, %v59_v42 }
  0x19   :  { %67 = vadd.xlane.f32.xlu0 %v66_v45 }
  0x8c   :  { %v68_v46 = vpop.xlane.xlu0 %67 }
  0x8d   :  { %v69_v47 = vsub.f32 0.0, %v68_v46 }
  0x8f   :  { %v70_v48 = vmul.f32 1.442695, %v69_v47 }
  0x91   :  { %94 = vpow2.f32 %v70_v48 }
  0x97   :  { %v95_v49 = vpop.eup %94 }
  0x98   :  { %v72_v50 = vadd.f32 1.0, %v95_v49 }
  0x9a   :  { %96 = vrcp.f32 %v72_v50  ;;  %v84_v54 = vand.u32 2147483648, %v72_v50  ;;  %v82_v56 = vand.u32 2147483647, %v72_v50  ;;  %vm78_vm1 = vweird.f32 %v72_v50 }
  0x9c   :  { %v85_v58 = vor.u32 1.1754944e-38, %v84_v54  ;;  %vm83_vm4 = vcmp.eq.f32.partialorder %v82_v56, 8.507059e+37 }
  0xa0   :  { %v97_v51 = vpop.eup %96 }
  0xa1   :  { %v74_v52 = vmul.f32 %v97_v51, %v72_v50  ;;  %vm79_vm0 = vweird.f32 %v97_v51 }
  0xa2   :  { %vm80_vm2 = vmor %vm78_vm1, %vm79_vm0 }
  0xa3   :  { %v75_v53 = vsub.f32 1.0, %v74_v52 }
  0xa5   :  { %v76_v55 = vmul.f32 %v97_v51, %v75_v53 }
  0xa7   :  { %v77_v57 = vadd.f32 %v97_v51, %v76_v55 }
  0xa9   :  { %v81_v59 = vsel %vm80_vm2, %v97_v51, %v77_v57 }
  0xaa   :  { %v86_v60 = vsel %vm83_vm4, %v85_v58, %v81_v59 }
  0xab   :  { %89 = vst.msk [vmem:[%s133_s2] sm:$0xff] %vm88_vm3, %v86_v60 }

</bundles_post_ra>
